<compile_context>
chip_gen: v7x
topology: tpu7x:2x2x1
jax: 0.10.0
libtpu: 0.0.40
codegen_flags: <defaults>
</compile_context>

<pallas_src>
import functools
import math

import jax
import jax.numpy as jnp
from jax.experimental import pallas as pl
from jax.experimental.pallas import tpu as pltpu


def _round_up(n, m):
    return ((n + m - 1) // m) * m


# ----------------------------------------------------------------------------
# Pallas kernel: one ResidualCouplingLayer (mean_only=True, gin_channels=0)
#   h     = Conv1x1_pre(x0) * mask
#   h     = WaveNet(h, mask)        (n_layers dilated convs + gated tanh/sigmoid)
#   stats = Conv1x1_post(skip) * mask
#   x1'   = stats + x1 * mask       (logs == 0 because mean_only)
# ----------------------------------------------------------------------------
def _coupling_kernel(x0_ref, x1_ref, mask_ref,
                     w_pre_ref, b_pre_ref,
                     w_in_t_ref, w_in_s_ref, b_in_t_ref, b_in_s_ref,
                     w_res_ref, w_skip_ref, b_res_ref, b_skip_ref,
                     w_post_ref, b_post_ref,
                     out_ref,
                     taps_ref,
                     *, n_layers, kernel_size, hidden, dilation_rate):
    T = x0_ref.shape[-1]
    x0 = x0_ref[0]                       # (half_pad, T) f32
    mask = mask_ref[0]                   # (1, T) f32

    # pre: Conv1d(half -> hidden, kernel 1) -- bf16 MXU inputs, f32 accumulation
    h = (jnp.dot(w_pre_ref[...], x0.astype(jnp.bfloat16),
                 preferred_element_type=jnp.float32)
         + b_pre_ref[...]) * mask        # (hidden, T) f32

    skip = jnp.zeros_like(h)
    # hoisted iota for the roll boundary masks
    col = jax.lax.broadcasted_iota(jnp.int32, (hidden, T), 1)

    for i in range(n_layers):            # n_layers is small -> static unroll is fine
        d = dilation_rate ** i
        # im2col: pack K boundary-zeroed, time-shifted copies of h along sublanes.
        for j in range(kernel_size):
            off = (j - (kernel_size - 1) // 2) * d
            if off == 0:
                tap = h
            else:
                # tap[:, t] = h[:, t + off], zero where t + off falls outside [0, T)
                tap = pltpu.roll(h, (-off) % T, axis=1)        # XLU lane rotate
                lo, hi = max(0, -off), min(T, T - off)
                tap = jnp.where((col >= lo) & (col < hi), tap, 0.0)
            taps_ref[pl.ds(j * hidden, hidden), :] = tap.astype(jnp.bfloat16)
        taps = taps_ref[...]             # (K*hidden, T) bf16

        # dilated Conv1d(hidden -> 2*hidden, kernel K) as ONE big-contraction matmul per
        # gate half; bias added once per layer.
        pre_t = (jnp.dot(w_in_t_ref[i], taps, preferred_element_type=jnp.float32)
                 + b_in_t_ref[i])
        pre_s = (jnp.dot(w_in_s_ref[i], taps, preferred_element_type=jnp.float32)
                 + b_in_s_ref[i])
        acts = jnp.tanh(pre_t) * jax.nn.sigmoid(pre_s)         # (hidden, T) f32
        acts_bf = acts.astype(jnp.bfloat16)
        # dropout p=0 -> identity

        # res/skip Conv1d(hidden -> 2*hidden, kernel 1), split into res/skip halves
        # (last layer's hidden-wide conv was packed into the skip half at init time).
        res = (jnp.dot(w_res_ref[i], acts_bf, preferred_element_type=jnp.float32)
               + b_res_ref[i])
        skp = (jnp.dot(w_skip_ref[i], acts_bf, preferred_element_type=jnp.float32)
               + b_skip_ref[i])
        h = (h + res) * mask
        skip = skip + skp

    skip = skip * mask

    # post: Conv1d(hidden -> half, kernel 1); mean_only => m = stats, logs = 0
    stats = (jnp.dot(w_post_ref[...], skip.astype(jnp.bfloat16),
                     preferred_element_type=jnp.float32)
             + b_post_ref[...]) * mask   # (half_pad, T)
    out_ref[0] = stats + x1_ref[0] * mask


def coupling_layer_pallas(x0, x1, x_mask, kp, *, n_layers, kernel_size, hidden,
                          dilation_rate, half, half_pad):
    """x0, x1: (B, half, Tp) f32 (Tp a multiple of 128); x_mask: (B, 1, Tp) f32."""
    B, _, Tp = x0.shape
    pad_c = half_pad - half
    x0p = jnp.pad(x0, ((0, 0), (0, pad_c), (0, 0)))
    x1p = jnp.pad(x1, ((0, 0), (0, pad_c), (0, 0)))
    KH = kernel_size * hidden

    kernel = functools.partial(_coupling_kernel, n_layers=n_layers,
                               kernel_size=kernel_size, hidden=hidden,
                               dilation_rate=dilation_rate)

    def full(shape):
        n = len(shape)
        return pl.BlockSpec(shape, lambda b, n=n: (0,) * n)

    weight_args = [kp['w_pre'], kp['b_pre'],
                   kp['w_in_t'], kp['w_in_s'], kp['b_in_t'], kp['b_in_s'],
                   kp['w_res'], kp['w_skip'], kp['b_res'], kp['b_skip'],
                   kp['w_post'], kp['b_post']]
    weight_specs = [full(tuple(w.shape)) for w in weight_args]

    act_shapes = [(1, half_pad, Tp), (1, half_pad, Tp), (1, 1, Tp)]
    act_specs = [pl.BlockSpec(s, lambda b: (b, 0, 0)) for s in act_shapes]

    # explicit VMEM budget: double-buffered input/output blocks + bf16 im2col scratch.
    resident = KH * Tp * 2
    for arr, blk in list(zip([x0p, x1p, x_mask], act_shapes)) + \
                    [(w, tuple(w.shape)) for w in weight_args]:
        resident += 2 * math.prod(blk) * arr.dtype.itemsize
    resident += 2 * half_pad * Tp * 4            # output block
    vmem_limit = int(min(max(16 * 2**20, 2 * resident), 64 * 2**20))

    out = pl.pallas_call(
        kernel,
        out_shape=jax.ShapeDtypeStruct((B, half_pad, Tp), jnp.float32),
        grid=(B,),
        in_specs=act_specs + weight_specs,
        out_specs=pl.BlockSpec((1, half_pad, Tp), lambda b: (b, 0, 0)),
        scratch_shapes=[pltpu.VMEM((KH, Tp), jnp.bfloat16)],
        compiler_params=pltpu.CompilerParams(
            dimension_semantics=("parallel",),
            vmem_limit_bytes=vmem_limit),
    )(x0p, x1p, x_mask, *weight_args)
    return out[:, :half, :]


def residual_coupling_block_forward(x, x_mask, flow_params, *, hidden, kernel_size,
                                    n_layers, dilation_rate):
    """ResidualCouplingBlock.forward(x, x_mask, g=None, reverse=False)."""
    B, C, T = x.shape
    half = C // 2
    half_pad = _round_up(half, 8)
    Tp = _round_up(T, 128)
    xp = jnp.pad(x, ((0, 0), (0, 0), (0, Tp - T)))
    mp = jnp.pad(x_mask, ((0, 0), (0, 0), (0, Tp - T)))
    for kp in flow_params:
        x0, x1 = xp[:, :half], xp[:, half:]
        x1n = coupling_layer_pallas(x0, x1, mp, kp, n_layers=n_layers,
                                    kernel_size=kernel_size, hidden=hidden,
                                    dilation_rate=dilation_rate,
                                    half=half, half_pad=half_pad)
        xp = jnp.concatenate([x0, x1n], axis=1)
        xp = xp[:, ::-1, :]   # Flip module: torch.flip(x, [1]) over the channel dim
    return xp[:, :, :T]


# ----------------------------------------------------------------------------
# Parameter init (deterministic), kernel-format packing, pure-JAX reference
# ----------------------------------------------------------------------------
def init_params(key, channels, hidden, kernel_size, n_layers, n_flows):
    half = channels // 2
    params = []
    for f in range(n_flows):
        ks = jax.random.split(jax.random.fold_in(key, f), 8)
        p = {
            'w_pre': 0.1 * jax.random.normal(ks[0], (hidden, half), jnp.float32),
            'b_pre': 0.1 * jax.random.normal(ks[1], (hidden, 1), jnp.float32),
            'w_in': 0.1 * jax.random.normal(ks[2], (n_layers, kernel_size, 2 * hidden, hidden), jnp.float32),
            'b_in': 0.1 * jax.random.normal(ks[3], (n_layers, 2 * hidden, 1), jnp.float32),
        }
        w_rs = 0.1 * jax.random.normal(ks[4], (n_layers, 2 * hidden, hidden), jnp.float32)
        b_rs = 0.1 * jax.random.normal(ks[5], (n_layers, 2 * hidden, 1), jnp.float32)
        # Last WaveNet layer's res_skip conv has only `hidden` outputs (pure skip):
        # pack it into the skip half and zero the residual half (identical math).
        w_rs = w_rs.at[n_layers - 1, :hidden].set(0.0)
        b_rs = b_rs.at[n_layers - 1, :hidden].set(0.0)
        p['w_rs'], p['b_rs'] = w_rs, b_rs
        # NOTE: PyTorch zero-initializes `post` (which would make the flow an identity on
        # x1); use small nonzero deterministic values so the kernel hot path is exercised.
        p['w_post'] = 0.05 * jax.random.normal(ks[6], (half, hidden), jnp.float32)
        p['b_post'] = 0.05 * jax.random.normal(ks[7], (half, 1), jnp.float32)
        params.append(p)
    return params


def prepare_flow_params(p, *, half, hidden, kernel_size, n_layers, half_pad):
    """Split gates/res-skip halves, im2col-pack tap weights, bf16-cast, pad channel dims."""
    L, K, H = n_layers, kernel_size, hidden
    bf = jnp.bfloat16
    w_in = p['w_in']                                             # (L, K, 2H, H)
    w_in_t = jnp.transpose(w_in[:, :, :H, :], (0, 2, 1, 3)).reshape(L, H, K * H)
    w_in_s = jnp.transpose(w_in[:, :, H:, :], (0, 2, 1, 3)).reshape(L, H, K * H)
    pad_c = half_pad - half
    return dict(
        w_pre=jnp.pad(p['w_pre'], ((0, 0), (0, pad_c))).astype(bf),
        b_pre=p['b_pre'],
        w_in_t=w_in_t.astype(bf), w_in_s=w_in_s.astype(bf),
        b_in_t=p['b_in'][:, :H, :], b_in_s=p['b_in'][:, H:, :],
        w_res=p['w_rs'][:, :H, :].astype(bf), w_skip=p['w_rs'][:, H:, :].astype(bf),
        b_res=p['b_rs'][:, :H, :], b_skip=p['b_rs'][:, H:, :],
        w_post=jnp.pad(p['w_post'], ((0, pad_c), (0, 0))).astype(bf),
        b_post=jnp.pad(p['b_post'], ((0, pad_c), (0, 0))),
    )


def _ref_coupling_layer(x, x_mask, p, dilation_rate, kernel_size, n_layers, hidden):
    half = x.shape[1] // 2
    x0, x1 = x[:, :half], x[:, half:]
    h = (jnp.einsum('oc,bct->bot', p['w_pre'], x0) + p['b_pre'][None]) * x_mask
    out = jnp.zeros_like(h)
    T = x.shape[-1]
    for i in range(n_layers):
        d = dilation_rate ** i
        pad = d * (kernel_size - 1) // 2
        hp = jnp.pad(h, ((0, 0), (0, 0), (pad, pad)))
        xin = jnp.zeros((x.shape[0], 2 * hidden, T)) + p['b_in'][i][None]
        for j in range(kernel_size):
            xin = xin + jnp.einsum('oc,bct->bot', p['w_in'][i, j], hp[:, :, j * d:j * d + T])
        acts = jnp.tanh(xin[:, :hidden]) * jax.nn.sigmoid(xin[:, hidden:])
        rs = jnp.einsum('oc,bct->bot', p['w_rs'][i], acts) + p['b_rs'][i][None]
        h = (h + rs[:, :hidden]) * x_mask
        out = out + rs[:, hidden:]
    out = out * x_mask
    stats = (jnp.einsum('oc,bct->bot', p['w_post'], out) + p['b_post'][None]) * x_mask
    x1n = stats + x1 * x_mask
    return jnp.concatenate([x0, x1n], axis=1)


def ref_block(x, x_mask, params, dilation_rate, kernel_size, n_layers, hidden):
    for p in params:
        x = _ref_coupling_layer(x, x_mask, p, dilation_rate, kernel_size, n_layers, hidden)
        x = x[:, ::-1, :]
    return x


if __name__ == "__main__":
    B, channels, hidden, T = 4, 4, 32, 64
    kernel_size, dilation_rate, n_layers, n_flows = 3, 2, 4, 4
    gin_channels = 0  # no conditioning (g=None)

    key = jax.random.PRNGKey(0)
    kx, kp = jax.random.split(key, 2)
    x = jax.random.normal(kx, (B, channels, T), jnp.float32)
    lengths = jnp.array([T, T - 16, T - 5, 32])
    x_mask = (jnp.arange(T)[None, :] < lengths[:, None]).astype(jnp.float32)[:, None, :]

    params = init_params(kp, channels, hidden, kernel_size, n_layers, n_flows)
    half = channels // 2
    half_pad = _round_up(half, 8)
    flow_params = [prepare_flow_params(p, half=half, hidden=hidden,
                                       kernel_size=kernel_size, n_layers=n_layers,
                                       half_pad=half_pad) for p in params]

    y = residual_coupling_block_forward(x, x_mask, flow_params,
                                        hidden=hidden, kernel_size=kernel_size,
                                        n_layers=n_layers, dilation_rate=dilation_rate)
    y = jax.block_until_ready(y)

    y_ref = ref_block(x, x_mask, params, dilation_rate, kernel_size, n_layers, hidden)
    err = float(jnp.max(jnp.abs(y - y_ref)))
    assert y.shape == (B, channels, T), y.shape
    # bf16 MXU operands with f32 accumulation -> relaxed tolerance vs the pure-f32 reference
    assert jnp.allclose(y, y_ref, atol=2e-2, rtol=2e-2), f"max abs err = {err}"
    print("KERNEL_OK")
</pallas_src>

<mosaic_0001>
module attributes {stable_mosaic.version = 11 : i64} {
  func.func @_coupling_kernel(%arg0: i32, %arg1: memref<1x8x128xf32, #tpu.memory_space<vmem>>, %arg2: memref<1x8x128xf32, #tpu.memory_space<vmem>>, %arg3: memref<1x1x128xf32, #tpu.memory_space<vmem>>, %arg4: memref<32x8xbf16, #tpu.memory_space<vmem>>, %arg5: memref<32x1xf32, #tpu.memory_space<vmem>>, %arg6: memref<4x32x96xbf16, #tpu.memory_space<vmem>>, %arg7: memref<4x32x96xbf16, #tpu.memory_space<vmem>>, %arg8: memref<4x32x1xf32, #tpu.memory_space<vmem>>, %arg9: memref<4x32x1xf32, #tpu.memory_space<vmem>>, %arg10: memref<4x32x32xbf16, #tpu.memory_space<vmem>>, %arg11: memref<4x32x32xbf16, #tpu.memory_space<vmem>>, %arg12: memref<4x32x1xf32, #tpu.memory_space<vmem>>, %arg13: memref<4x32x1xf32, #tpu.memory_space<vmem>>, %arg14: memref<8x32xbf16, #tpu.memory_space<vmem>>, %arg15: memref<8x1xf32, #tpu.memory_space<vmem>>, %arg16: memref<1x8x128xf32, #tpu.memory_space<vmem>>, %arg17: memref<96x128xbf16, #tpu.memory_space<vmem>>) attributes {dimension_semantics = [#tpu.dimension_semantics<parallel>], iteration_bounds = array<i64: 4>, scalar_prefetch = 0 : i64, scratch_operands = 1 : i64, tpu.core_type = #tpu.core_type<tc>, window_params = [{transform_indices = @transform_0, window_bounds = array<i64: 1, 8, 128>}, {transform_indices = @transform_1, window_bounds = array<i64: 1, 8, 128>}, {transform_indices = @transform_2, window_bounds = array<i64: 1, 1, 128>}, {pipeline_mode = #tpu.pipeline_mode<synchronous>, transform_indices = @transform_3, window_bounds = array<i64: 32, 8>}, {pipeline_mode = #tpu.pipeline_mode<synchronous>, transform_indices = @transform_4, window_bounds = array<i64: 32, 1>}, {pipeline_mode = #tpu.pipeline_mode<synchronous>, transform_indices = @transform_5, window_bounds = array<i64: 4, 32, 96>}, {pipeline_mode = #tpu.pipeline_mode<synchronous>, transform_indices = @transform_6, window_bounds = array<i64: 4, 32, 96>}, {pipeline_mode = #tpu.pipeline_mode<synchronous>, transform_indices = @transform_7, window_bounds = array<i64: 4, 32, 1>}, {pipeline_mode = #tpu.pipeline_mode<synchronous>, transform_indices = @transform_8, window_bounds = array<i64: 4, 32, 1>}, {pipeline_mode = #tpu.pipeline_mode<synchronous>, transform_indices = @transform_9, window_bounds = array<i64: 4, 32, 32>}, {pipeline_mode = #tpu.pipeline_mode<synchronous>, transform_indices = @transform_10, window_bounds = array<i64: 4, 32, 32>}, {pipeline_mode = #tpu.pipeline_mode<synchronous>, transform_indices = @transform_11, window_bounds = array<i64: 4, 32, 1>}, {pipeline_mode = #tpu.pipeline_mode<synchronous>, transform_indices = @transform_12, window_bounds = array<i64: 4, 32, 1>}, {pipeline_mode = #tpu.pipeline_mode<synchronous>, transform_indices = @transform_13, window_bounds = array<i64: 8, 32>}, {pipeline_mode = #tpu.pipeline_mode<synchronous>, transform_indices = @transform_14, window_bounds = array<i64: 8, 1>}, {transform_indices = @transform_15, window_bounds = array<i64: 1, 8, 128>}]} {
    %c0 = arith.constant 0 : index
    %c0_0 = arith.constant 0 : index
    %c0_1 = arith.constant 0 : index
    %0 = vector.load %arg1[%c0, %c0_0, %c0_1] : memref<1x8x128xf32, #tpu.memory_space<vmem>>, vector<1x8x128xf32>
    %1 = vector.shape_cast %0 : vector<1x8x128xf32> to vector<8x128xf32>
    %c0_2 = arith.constant 0 : index
    %c0_3 = arith.constant 0 : index
    %c0_4 = arith.constant 0 : index
    %2 = vector.load %arg3[%c0_2, %c0_3, %c0_4] : memref<1x1x128xf32, #tpu.memory_space<vmem>>, vector<1x1x128xf32>
    %3 = vector.shape_cast %2 : vector<1x1x128xf32> to vector<1x128xf32>
    %c0_5 = arith.constant 0 : index
    %c0_6 = arith.constant 0 : index
    %4 = vector.load %arg4[%c0_5, %c0_6] : memref<32x8xbf16, #tpu.memory_space<vmem>>, vector<32x8xbf16>
    %5 = arith.truncf %1 : vector<8x128xf32> to vector<8x128xbf16>
    %cst = arith.constant dense<0.000000e+00> : vector<32x128xf32>
    %6 = tpu.matmul %4, %5, %cst {dimension_numbers = #tpu.dot_dimension_numbers<[1], [0], [0], [1], [0, 0, 1, 1], [], []>} : vector<32x8xbf16>, vector<8x128xbf16>, vector<32x128xf32> -> vector<32x128xf32>
    %c0_7 = arith.constant 0 : index
    %c0_8 = arith.constant 0 : index
    %7 = vector.load %arg5[%c0_7, %c0_8] : memref<32x1xf32, #tpu.memory_space<vmem>>, vector<32x1xf32>
    %8 = vector.broadcast %7 : vector<32x1xf32> to vector<32x128xf32>
    %9 = arith.addf %6, %8 : vector<32x128xf32>
    %10 = vector.broadcast %3 : vector<1x128xf32> to vector<32x128xf32>
    %11 = arith.mulf %9, %10 : vector<32x128xf32>
    %cst_9 = arith.constant 0.000000e+00 : f32
    %12 = vector.broadcast %cst_9 : f32 to vector<32x128xf32>
    %13 = tpu.iota {dimensions = array<i32: 1>} : vector<32x128xi32>
    %c1_i32 = arith.constant 1 : i32
    %14 = tpu.dynamic_rotate %11 by %c1_i32 dim 1 : vector<32x128xf32>, i32 -> vector<32x128xf32>
    %c1_i32_10 = arith.constant 1 : i32
    %15 = vector.broadcast %c1_i32_10 : i32 to vector<32x128xi32>
    %16 = arith.cmpi sge, %13, %15 : vector<32x128xi32>
    %c128_i32 = arith.constant 128 : i32
    %17 = vector.broadcast %c128_i32 : i32 to vector<32x128xi32>
    %18 = arith.cmpi slt, %13, %17 : vector<32x128xi32>
    %19 = arith.andi %16, %18 : vector<32x128xi1>
    %cst_11 = arith.constant 0.000000e+00 : f32
    %20 = vector.broadcast %cst_11 : f32 to vector<32x128xf32>
    %21 = arith.select %19, %14, %20 : vector<32x128xi1>, vector<32x128xf32>
    %22 = arith.truncf %21 : vector<32x128xf32> to vector<32x128xbf16>
    %c0_12 = arith.constant 0 : index
    %c0_13 = arith.constant 0 : index
    %23 = vector.load %arg17[%c0_12, %c0_13] : memref<96x128xbf16, #tpu.memory_space<vmem>>, vector<32x128xbf16>
    tpu.vector_store %arg17[%c0_12, %c0_13], %22 {strides = array<i32>} : memref<96x128xbf16, #tpu.memory_space<vmem>>, vector<32x128xbf16>,
    %24 = arith.truncf %11 : vector<32x128xf32> to vector<32x128xbf16>
    %c32 = arith.constant 32 : index
    %c0_14 = arith.constant 0 : index
    %25 = vector.load %arg17[%c32, %c0_14] : memref<96x128xbf16, #tpu.memory_space<vmem>>, vector<32x128xbf16>
    tpu.vector_store %arg17[%c32, %c0_14], %24 {strides = array<i32>} : memref<96x128xbf16, #tpu.memory_space<vmem>>, vector<32x128xbf16>,
    %c127_i32 = arith.constant 127 : i32
    %26 = tpu.dynamic_rotate %11 by %c127_i32 dim 1 : vector<32x128xf32>, i32 -> vector<32x128xf32>
    %c0_i32 = arith.constant 0 : i32
    %27 = vector.broadcast %c0_i32 : i32 to vector<32x128xi32>
    %28 = arith.cmpi sge, %13, %27 : vector<32x128xi32>
    %c127_i32_15 = arith.constant 127 : i32
    %29 = vector.broadcast %c127_i32_15 : i32 to vector<32x128xi32>
    %30 = arith.cmpi slt, %13, %29 : vector<32x128xi32>
    %31 = arith.andi %28, %30 : vector<32x128xi1>
    %cst_16 = arith.constant 0.000000e+00 : f32
    %32 = vector.broadcast %cst_16 : f32 to vector<32x128xf32>
    %33 = arith.select %31, %26, %32 : vector<32x128xi1>, vector<32x128xf32>
    %34 = arith.truncf %33 : vector<32x128xf32> to vector<32x128xbf16>
    %c64 = arith.constant 64 : index
    %c0_17 = arith.constant 0 : index
    %35 = vector.load %arg17[%c64, %c0_17] : memref<96x128xbf16, #tpu.memory_space<vmem>>, vector<32x128xbf16>
    tpu.vector_store %arg17[%c64, %c0_17], %34 {strides = array<i32>} : memref<96x128xbf16, #tpu.memory_space<vmem>>, vector<32x128xbf16>,
    %c0_18 = arith.constant 0 : index
    %c0_19 = arith.constant 0 : index
    %36 = vector.load %arg17[%c0_18, %c0_19] : memref<96x128xbf16, #tpu.memory_space<vmem>>, vector<96x128xbf16>
    %c0_20 = arith.constant 0 : index
    %c0_21 = arith.constant 0 : index
    %c0_22 = arith.constant 0 : index
    %37 = vector.load %arg6[%c0_20, %c0_21, %c0_22] : memref<4x32x96xbf16, #tpu.memory_space<vmem>>, vector<1x32x96xbf16>
    %38 = vector.shape_cast %37 : vector<1x32x96xbf16> to vector<32x96xbf16>
    %cst_23 = arith.constant dense<0.000000e+00> : vector<32x128xf32>
    %39 = tpu.matmul %38, %36, %cst_23 {dimension_numbers = #tpu.dot_dimension_numbers<[1], [0], [0], [1], [0, 0, 1, 1], [], []>} : vector<32x96xbf16>, vector<96x128xbf16>, vector<32x128xf32> -> vector<32x128xf32>
    %c0_24 = arith.constant 0 : index
    %c0_25 = arith.constant 0 : index
    %c0_26 = arith.constant 0 : index
    %40 = vector.load %arg8[%c0_24, %c0_25, %c0_26] : memref<4x32x1xf32, #tpu.memory_space<vmem>>, vector<1x32x1xf32>
    %41 = vector.shape_cast %40 : vector<1x32x1xf32> to vector<32x1xf32>
    %42 = vector.broadcast %41 : vector<32x1xf32> to vector<32x128xf32>
    %43 = arith.addf %39, %42 : vector<32x128xf32>
    %c0_27 = arith.constant 0 : index
    %c0_28 = arith.constant 0 : index
    %c0_29 = arith.constant 0 : index
    %44 = vector.load %arg7[%c0_27, %c0_28, %c0_29] : memref<4x32x96xbf16, #tpu.memory_space<vmem>>, vector<1x32x96xbf16>
    %45 = vector.shape_cast %44 : vector<1x32x96xbf16> to vector<32x96xbf16>
    %cst_30 = arith.constant dense<0.000000e+00> : vector<32x128xf32>
    %46 = tpu.matmul %45, %36, %cst_30 {dimension_numbers = #tpu.dot_dimension_numbers<[1], [0], [0], [1], [0, 0, 1, 1], [], []>} : vector<32x96xbf16>, vector<96x128xbf16>, vector<32x128xf32> -> vector<32x128xf32>
    %c0_31 = arith.constant 0 : index
    %c0_32 = arith.constant 0 : index
    %c0_33 = arith.constant 0 : index
    %47 = vector.load %arg9[%c0_31, %c0_32, %c0_33] : memref<4x32x1xf32, #tpu.memory_space<vmem>>, vector<1x32x1xf32>
    %48 = vector.shape_cast %47 : vector<1x32x1xf32> to vector<32x1xf32>
    %49 = vector.broadcast %48 : vector<32x1xf32> to vector<32x128xf32>
    %50 = arith.addf %46, %49 : vector<32x128xf32>
    %51 = math.tanh %43 : vector<32x128xf32>
    %52 = arith.negf %50 : vector<32x128xf32>
    %53 = math.exp %52 : vector<32x128xf32>
    %cst_34 = arith.constant 1.000000e+00 : f32
    %54 = vector.broadcast %cst_34 : f32 to vector<32x128xf32>
    %55 = arith.addf %54, %53 : vector<32x128xf32>
    %56 = arith.divf %54, %55 : vector<32x128xf32>
    %57 = arith.mulf %51, %56 : vector<32x128xf32>
    %58 = arith.truncf %57 : vector<32x128xf32> to vector<32x128xbf16>
    %c0_35 = arith.constant 0 : index
    %c0_36 = arith.constant 0 : index
    %c0_37 = arith.constant 0 : index
    %59 = vector.load %arg10[%c0_35, %c0_36, %c0_37] : memref<4x32x32xbf16, #tpu.memory_space<vmem>>, vector<1x32x32xbf16>
    %60 = vector.shape_cast %59 : vector<1x32x32xbf16> to vector<32x32xbf16>
    %cst_38 = arith.constant dense<0.000000e+00> : vector<32x128xf32>
    %61 = tpu.matmul %60, %58, %cst_38 {dimension_numbers = #tpu.dot_dimension_numbers<[1], [0], [0], [1], [0, 0, 1, 1], [], []>} : vector<32x32xbf16>, vector<32x128xbf16>, vector<32x128xf32> -> vector<32x128xf32>
    %c0_39 = arith.constant 0 : index
    %c0_40 = arith.constant 0 : index
    %c0_41 = arith.constant 0 : index
    %62 = vector.load %arg12[%c0_39, %c0_40, %c0_41] : memref<4x32x1xf32, #tpu.memory_space<vmem>>, vector<1x32x1xf32>
    %63 = vector.shape_cast %62 : vector<1x32x1xf32> to vector<32x1xf32>
    %64 = vector.broadcast %63 : vector<32x1xf32> to vector<32x128xf32>
    %65 = arith.addf %61, %64 : vector<32x128xf32>
    %c0_42 = arith.constant 0 : index
    %c0_43 = arith.constant 0 : index
    %c0_44 = arith.constant 0 : index
    %66 = vector.load %arg11[%c0_42, %c0_43, %c0_44] : memref<4x32x32xbf16, #tpu.memory_space<vmem>>, vector<1x32x32xbf16>
    %67 = vector.shape_cast %66 : vector<1x32x32xbf16> to vector<32x32xbf16>
    %cst_45 = arith.constant dense<0.000000e+00> : vector<32x128xf32>
    %68 = tpu.matmul %67, %58, %cst_45 {dimension_numbers = #tpu.dot_dimension_numbers<[1], [0], [0], [1], [0, 0, 1, 1], [], []>} : vector<32x32xbf16>, vector<32x128xbf16>, vector<32x128xf32> -> vector<32x128xf32>
    %c0_46 = arith.constant 0 : index
    %c0_47 = arith.constant 0 : index
    %c0_48 = arith.constant 0 : index
    %69 = vector.load %arg13[%c0_46, %c0_47, %c0_48] : memref<4x32x1xf32, #tpu.memory_space<vmem>>, vector<1x32x1xf32>
    %70 = vector.shape_cast %69 : vector<1x32x1xf32> to vector<32x1xf32>
    %71 = vector.broadcast %70 : vector<32x1xf32> to vector<32x128xf32>
    %72 = arith.addf %68, %71 : vector<32x128xf32>
    %73 = arith.addf %11, %65 : vector<32x128xf32>
    %74 = vector.broadcast %3 : vector<1x128xf32> to vector<32x128xf32>
    %75 = arith.mulf %73, %74 : vector<32x128xf32>
    %76 = arith.addf %12, %72 : vector<32x128xf32>
    %c2_i32 = arith.constant 2 : i32
    %77 = tpu.dynamic_rotate %75 by %c2_i32 dim 1 : vector<32x128xf32>, i32 -> vector<32x128xf32>
    %c2_i32_49 = arith.constant 2 : i32
    %78 = vector.broadcast %c2_i32_49 : i32 to vector<32x128xi32>
    %79 = arith.cmpi sge, %13, %78 : vector<32x128xi32>
    %c128_i32_50 = arith.constant 128 : i32
    %80 = vector.broadcast %c128_i32_50 : i32 to vector<32x128xi32>
    %81 = arith.cmpi slt, %13, %80 : vector<32x128xi32>
    %82 = arith.andi %79, %81 : vector<32x128xi1>
    %cst_51 = arith.constant 0.000000e+00 : f32
    %83 = vector.broadcast %cst_51 : f32 to vector<32x128xf32>
    %84 = arith.select %82, %77, %83 : vector<32x128xi1>, vector<32x128xf32>
    %85 = arith.truncf %84 : vector<32x128xf32> to vector<32x128xbf16>
    %c0_52 = arith.constant 0 : index
    %c0_53 = arith.constant 0 : index
    %86 = vector.load %arg17[%c0_52, %c0_53] : memref<96x128xbf16, #tpu.memory_space<vmem>>, vector<32x128xbf16>
    tpu.vector_store %arg17[%c0_52, %c0_53], %85 {strides = array<i32>} : memref<96x128xbf16, #tpu.memory_space<vmem>>, vector<32x128xbf16>,
    %87 = arith.truncf %75 : vector<32x128xf32> to vector<32x128xbf16>
    %c32_54 = arith.constant 32 : index
    %c0_55 = arith.constant 0 : index
    %88 = vector.load %arg17[%c32_54, %c0_55] : memref<96x128xbf16, #tpu.memory_space<vmem>>, vector<32x128xbf16>
    tpu.vector_store %arg17[%c32_54, %c0_55], %87 {strides = array<i32>} : memref<96x128xbf16, #tpu.memory_space<vmem>>, vector<32x128xbf16>,
    %c126_i32 = arith.constant 126 : i32
    %89 = tpu.dynamic_rotate %75 by %c126_i32 dim 1 : vector<32x128xf32>, i32 -> vector<32x128xf32>
    %c0_i32_56 = arith.constant 0 : i32
    %90 = vector.broadcast %c0_i32_56 : i32 to vector<32x128xi32>
    %91 = arith.cmpi sge, %13, %90 : vector<32x128xi32>
    %c126_i32_57 = arith.constant 126 : i32
    %92 = vector.broadcast %c126_i32_57 : i32 to vector<32x128xi32>
    %93 = arith.cmpi slt, %13, %92 : vector<32x128xi32>
    %94 = arith.andi %91, %93 : vector<32x128xi1>
    %cst_58 = arith.constant 0.000000e+00 : f32
    %95 = vector.broadcast %cst_58 : f32 to vector<32x128xf32>
    %96 = arith.select %94, %89, %95 : vector<32x128xi1>, vector<32x128xf32>
    %97 = arith.truncf %96 : vector<32x128xf32> to vector<32x128xbf16>
    %c64_59 = arith.constant 64 : index
    %c0_60 = arith.constant 0 : index
    %98 = vector.load %arg17[%c64_59, %c0_60] : memref<96x128xbf16, #tpu.memory_space<vmem>>, vector<32x128xbf16>
    tpu.vector_store %arg17[%c64_59, %c0_60], %97 {strides = array<i32>} : memref<96x128xbf16, #tpu.memory_space<vmem>>, vector<32x128xbf16>,
    %c0_61 = arith.constant 0 : index
    %c0_62 = arith.constant 0 : index
    %99 = vector.load %arg17[%c0_61, %c0_62] : memref<96x128xbf16, #tpu.memory_space<vmem>>, vector<96x128xbf16>
    %c1 = arith.constant 1 : index
    %c0_63 = arith.constant 0 : index
    %c0_64 = arith.constant 0 : index
    %100 = vector.load %arg6[%c1, %c0_63, %c0_64] : memref<4x32x96xbf16, #tpu.memory_space<vmem>>, vector<1x32x96xbf16>
    %101 = vector.shape_cast %100 : vector<1x32x96xbf16> to vector<32x96xbf16>
    %cst_65 = arith.constant dense<0.000000e+00> : vector<32x128xf32>
    %102 = tpu.matmul %101, %99, %cst_65 {dimension_numbers = #tpu.dot_dimension_numbers<[1], [0], [0], [1], [0, 0, 1, 1], [], []>} : vector<32x96xbf16>, vector<96x128xbf16>, vector<32x128xf32> -> vector<32x128xf32>
    %c1_66 = arith.constant 1 : index
    %c0_67 = arith.constant 0 : index
    %c0_68 = arith.constant 0 : index
    %103 = vector.load %arg8[%c1_66, %c0_67, %c0_68] : memref<4x32x1xf32, #tpu.memory_space<vmem>>, vector<1x32x1xf32>
    %104 = vector.shape_cast %103 : vector<1x32x1xf32> to vector<32x1xf32>
    %105 = vector.broadcast %104 : vector<32x1xf32> to vector<32x128xf32>
    %106 = arith.addf %102, %105 : vector<32x128xf32>
    %c1_69 = arith.constant 1 : index
    %c0_70 = arith.constant 0 : index
    %c0_71 = arith.constant 0 : index
    %107 = vector.load %arg7[%c1_69, %c0_70, %c0_71] : memref<4x32x96xbf16, #tpu.memory_space<vmem>>, vector<1x32x96xbf16>
    %108 = vector.shape_cast %107 : vector<1x32x96xbf16> to vector<32x96xbf16>
    %cst_72 = arith.constant dense<0.000000e+00> : vector<32x128xf32>
    %109 = tpu.matmul %108, %99, %cst_72 {dimension_numbers = #tpu.dot_dimension_numbers<[1], [0], [0], [1], [0, 0, 1, 1], [], []>} : vector<32x96xbf16>, vector<96x128xbf16>, vector<32x128xf32> -> vector<32x128xf32>
    %c1_73 = arith.constant 1 : index
    %c0_74 = arith.constant 0 : index
    %c0_75 = arith.constant 0 : index
    %110 = vector.load %arg9[%c1_73, %c0_74, %c0_75] : memref<4x32x1xf32, #tpu.memory_space<vmem>>, vector<1x32x1xf32>
    %111 = vector.shape_cast %110 : vector<1x32x1xf32> to vector<32x1xf32>
    %112 = vector.broadcast %111 : vector<32x1xf32> to vector<32x128xf32>
    %113 = arith.addf %109, %112 : vector<32x128xf32>
    %114 = math.tanh %106 : vector<32x128xf32>
    %115 = arith.negf %113 : vector<32x128xf32>
    %116 = math.exp %115 : vector<32x128xf32>
    %cst_76 = arith.constant 1.000000e+00 : f32
    %117 = vector.broadcast %cst_76 : f32 to vector<32x128xf32>
    %118 = arith.addf %117, %116 : vector<32x128xf32>
    %119 = arith.divf %117, %118 : vector<32x128xf32>
    %120 = arith.mulf %114, %119 : vector<32x128xf32>
    %121 = arith.truncf %120 : vector<32x128xf32> to vector<32x128xbf16>
    %c1_77 = arith.constant 1 : index
    %c0_78 = arith.constant 0 : index
    %c0_79 = arith.constant 0 : index
    %122 = vector.load %arg10[%c1_77, %c0_78, %c0_79] : memref<4x32x32xbf16, #tpu.memory_space<vmem>>, vector<1x32x32xbf16>
    %123 = vector.shape_cast %122 : vector<1x32x32xbf16> to vector<32x32xbf16>
    %cst_80 = arith.constant dense<0.000000e+00> : vector<32x128xf32>
    %124 = tpu.matmul %123, %121, %cst_80 {dimension_numbers = #tpu.dot_dimension_numbers<[1], [0], [0], [1], [0, 0, 1, 1], [], []>} : vector<32x32xbf16>, vector<32x128xbf16>, vector<32x128xf32> -> vector<32x128xf32>
    %c1_81 = arith.constant 1 : index
    %c0_82 = arith.constant 0 : index
    %c0_83 = arith.constant 0 : index
    %125 = vector.load %arg12[%c1_81, %c0_82, %c0_83] : memref<4x32x1xf32, #tpu.memory_space<vmem>>, vector<1x32x1xf32>
    %126 = vector.shape_cast %125 : vector<1x32x1xf32> to vector<32x1xf32>
    %127 = vector.broadcast %126 : vector<32x1xf32> to vector<32x128xf32>
    %128 = arith.addf %124, %127 : vector<32x128xf32>
    %c1_84 = arith.constant 1 : index
    %c0_85 = arith.constant 0 : index
    %c0_86 = arith.constant 0 : index
    %129 = vector.load %arg11[%c1_84, %c0_85, %c0_86] : memref<4x32x32xbf16, #tpu.memory_space<vmem>>, vector<1x32x32xbf16>
    %130 = vector.shape_cast %129 : vector<1x32x32xbf16> to vector<32x32xbf16>
    %cst_87 = arith.constant dense<0.000000e+00> : vector<32x128xf32>
    %131 = tpu.matmul %130, %121, %cst_87 {dimension_numbers = #tpu.dot_dimension_numbers<[1], [0], [0], [1], [0, 0, 1, 1], [], []>} : vector<32x32xbf16>, vector<32x128xbf16>, vector<32x128xf32> -> vector<32x128xf32>
    %c1_88 = arith.constant 1 : index
    %c0_89 = arith.constant 0 : index
    %c0_90 = arith.constant 0 : index
    %132 = vector.load %arg13[%c1_88, %c0_89, %c0_90] : memref<4x32x1xf32, #tpu.memory_space<vmem>>, vector<1x32x1xf32>
    %133 = vector.shape_cast %132 : vector<1x32x1xf32> to vector<32x1xf32>
    %134 = vector.broadcast %133 : vector<32x1xf32> to vector<32x128xf32>
    %135 = arith.addf %131, %134 : vector<32x128xf32>
    %136 = arith.addf %75, %128 : vector<32x128xf32>
    %137 = vector.broadcast %3 : vector<1x128xf32> to vector<32x128xf32>
    %138 = arith.mulf %136, %137 : vector<32x128xf32>
    %139 = arith.addf %76, %135 : vector<32x128xf32>
    %c4_i32 = arith.constant 4 : i32
    %140 = tpu.dynamic_rotate %138 by %c4_i32 dim 1 : vector<32x128xf32>, i32 -> vector<32x128xf32>
    %c4_i32_91 = arith.constant 4 : i32
    %141 = vector.broadcast %c4_i32_91 : i32 to vector<32x128xi32>
    %142 = arith.cmpi sge, %13, %141 : vector<32x128xi32>
    %c128_i32_92 = arith.constant 128 : i32
    %143 = vector.broadcast %c128_i32_92 : i32 to vector<32x128xi32>
    %144 = arith.cmpi slt, %13, %143 : vector<32x128xi32>
    %145 = arith.andi %142, %144 : vector<32x128xi1>
    %cst_93 = arith.constant 0.000000e+00 : f32
    %146 = vector.broadcast %cst_93 : f32 to vector<32x128xf32>
    %147 = arith.select %145, %140, %146 : vector<32x128xi1>, vector<32x128xf32>
    %148 = arith.truncf %147 : vector<32x128xf32> to vector<32x128xbf16>
    %c0_94 = arith.constant 0 : index
    %c0_95 = arith.constant 0 : index
    %149 = vector.load %arg17[%c0_94, %c0_95] : memref<96x128xbf16, #tpu.memory_space<vmem>>, vector<32x128xbf16>
    tpu.vector_store %arg17[%c0_94, %c0_95], %148 {strides = array<i32>} : memref<96x128xbf16, #tpu.memory_space<vmem>>, vector<32x128xbf16>,
    %150 = arith.truncf %138 : vector<32x128xf32> to vector<32x128xbf16>
    %c32_96 = arith.constant 32 : index
    %c0_97 = arith.constant 0 : index
    %151 = vector.load %arg17[%c32_96, %c0_97] : memref<96x128xbf16, #tpu.memory_space<vmem>>, vector<32x128xbf16>
    tpu.vector_store %arg17[%c32_96, %c0_97], %150 {strides = array<i32>} : memref<96x128xbf16, #tpu.memory_space<vmem>>, vector<32x128xbf16>,
    %c124_i32 = arith.constant 124 : i32
    %152 = tpu.dynamic_rotate %138 by %c124_i32 dim 1 : vector<32x128xf32>, i32 -> vector<32x128xf32>
    %c0_i32_98 = arith.constant 0 : i32
    %153 = vector.broadcast %c0_i32_98 : i32 to vector<32x128xi32>
    %154 = arith.cmpi sge, %13, %153 : vector<32x128xi32>
    %c124_i32_99 = arith.constant 124 : i32
    %155 = vector.broadcast %c124_i32_99 : i32 to vector<32x128xi32>
    %156 = arith.cmpi slt, %13, %155 : vector<32x128xi32>
    %157 = arith.andi %154, %156 : vector<32x128xi1>
    %cst_100 = arith.constant 0.000000e+00 : f32
    %158 = vector.broadcast %cst_100 : f32 to vector<32x128xf32>
    %159 = arith.select %157, %152, %158 : vector<32x128xi1>, vector<32x128xf32>
    %160 = arith.truncf %159 : vector<32x128xf32> to vector<32x128xbf16>
    %c64_101 = arith.constant 64 : index
    %c0_102 = arith.constant 0 : index
    %161 = vector.load %arg17[%c64_101, %c0_102] : memref<96x128xbf16, #tpu.memory_space<vmem>>, vector<32x128xbf16>
    tpu.vector_store %arg17[%c64_101, %c0_102], %160 {strides = array<i32>} : memref<96x128xbf16, #tpu.memory_space<vmem>>, vector<32x128xbf16>,
    %c0_103 = arith.constant 0 : index
    %c0_104 = arith.constant 0 : index
    %162 = vector.load %arg17[%c0_103, %c0_104] : memref<96x128xbf16, #tpu.memory_space<vmem>>, vector<96x128xbf16>
    %c2 = arith.constant 2 : index
    %c0_105 = arith.constant 0 : index
    %c0_106 = arith.constant 0 : index
    %163 = vector.load %arg6[%c2, %c0_105, %c0_106] : memref<4x32x96xbf16, #tpu.memory_space<vmem>>, vector<1x32x96xbf16>
    %164 = vector.shape_cast %163 : vector<1x32x96xbf16> to vector<32x96xbf16>
    %cst_107 = arith.constant dense<0.000000e+00> : vector<32x128xf32>
    %165 = tpu.matmul %164, %162, %cst_107 {dimension_numbers = #tpu.dot_dimension_numbers<[1], [0], [0], [1], [0, 0, 1, 1], [], []>} : vector<32x96xbf16>, vector<96x128xbf16>, vector<32x128xf32> -> vector<32x128xf32>
    %c2_108 = arith.constant 2 : index
    %c0_109 = arith.constant 0 : index
    %c0_110 = arith.constant 0 : index
    %166 = vector.load %arg8[%c2_108, %c0_109, %c0_110] : memref<4x32x1xf32, #tpu.memory_space<vmem>>, vector<1x32x1xf32>
    %167 = vector.shape_cast %166 : vector<1x32x1xf32> to vector<32x1xf32>
    %168 = vector.broadcast %167 : vector<32x1xf32> to vector<32x128xf32>
    %169 = arith.addf %165, %168 : vector<32x128xf32>
    %c2_111 = arith.constant 2 : index
    %c0_112 = arith.constant 0 : index
    %c0_113 = arith.constant 0 : index
    %170 = vector.load %arg7[%c2_111, %c0_112, %c0_113] : memref<4x32x96xbf16, #tpu.memory_space<vmem>>, vector<1x32x96xbf16>
    %171 = vector.shape_cast %170 : vector<1x32x96xbf16> to vector<32x96xbf16>
    %cst_114 = arith.constant dense<0.000000e+00> : vector<32x128xf32>
    %172 = tpu.matmul %171, %162, %cst_114 {dimension_numbers = #tpu.dot_dimension_numbers<[1], [0], [0], [1], [0, 0, 1, 1], [], []>} : vector<32x96xbf16>, vector<96x128xbf16>, vector<32x128xf32> -> vector<32x128xf32>
    %c2_115 = arith.constant 2 : index
    %c0_116 = arith.constant 0 : index
    %c0_117 = arith.constant 0 : index
    %173 = vector.load %arg9[%c2_115, %c0_116, %c0_117] : memref<4x32x1xf32, #tpu.memory_space<vmem>>, vector<1x32x1xf32>
    %174 = vector.shape_cast %173 : vector<1x32x1xf32> to vector<32x1xf32>
    %175 = vector.broadcast %174 : vector<32x1xf32> to vector<32x128xf32>
    %176 = arith.addf %172, %175 : vector<32x128xf32>
    %177 = math.tanh %169 : vector<32x128xf32>
    %178 = arith.negf %176 : vector<32x128xf32>
    %179 = math.exp %178 : vector<32x128xf32>
    %cst_118 = arith.constant 1.000000e+00 : f32
    %180 = vector.broadcast %cst_118 : f32 to vector<32x128xf32>
    %181 = arith.addf %180, %179 : vector<32x128xf32>
    %182 = arith.divf %180, %181 : vector<32x128xf32>
    %183 = arith.mulf %177, %182 : vector<32x128xf32>
    %184 = arith.truncf %183 : vector<32x128xf32> to vector<32x128xbf16>
    %c2_119 = arith.constant 2 : index
    %c0_120 = arith.constant 0 : index
    %c0_121 = arith.constant 0 : index
    %185 = vector.load %arg10[%c2_119, %c0_120, %c0_121] : memref<4x32x32xbf16, #tpu.memory_space<vmem>>, vector<1x32x32xbf16>
    %186 = vector.shape_cast %185 : vector<1x32x32xbf16> to vector<32x32xbf16>
    %cst_122 = arith.constant dense<0.000000e+00> : vector<32x128xf32>
    %187 = tpu.matmul %186, %184, %cst_122 {dimension_numbers = #tpu.dot_dimension_numbers<[1], [0], [0], [1], [0, 0, 1, 1], [], []>} : vector<32x32xbf16>, vector<32x128xbf16>, vector<32x128xf32> -> vector<32x128xf32>
    %c2_123 = arith.constant 2 : index
    %c0_124 = arith.constant 0 : index
    %c0_125 = arith.constant 0 : index
    %188 = vector.load %arg12[%c2_123, %c0_124, %c0_125] : memref<4x32x1xf32, #tpu.memory_space<vmem>>, vector<1x32x1xf32>
    %189 = vector.shape_cast %188 : vector<1x32x1xf32> to vector<32x1xf32>
    %190 = vector.broadcast %189 : vector<32x1xf32> to vector<32x128xf32>
    %191 = arith.addf %187, %190 : vector<32x128xf32>
    %c2_126 = arith.constant 2 : index
    %c0_127 = arith.constant 0 : index
    %c0_128 = arith.constant 0 : index
    %192 = vector.load %arg11[%c2_126, %c0_127, %c0_128] : memref<4x32x32xbf16, #tpu.memory_space<vmem>>, vector<1x32x32xbf16>
    %193 = vector.shape_cast %192 : vector<1x32x32xbf16> to vector<32x32xbf16>
    %cst_129 = arith.constant dense<0.000000e+00> : vector<32x128xf32>
    %194 = tpu.matmul %193, %184, %cst_129 {dimension_numbers = #tpu.dot_dimension_numbers<[1], [0], [0], [1], [0, 0, 1, 1], [], []>} : vector<32x32xbf16>, vector<32x128xbf16>, vector<32x128xf32> -> vector<32x128xf32>
    %c2_130 = arith.constant 2 : index
    %c0_131 = arith.constant 0 : index
    %c0_132 = arith.constant 0 : index
    %195 = vector.load %arg13[%c2_130, %c0_131, %c0_132] : memref<4x32x1xf32, #tpu.memory_space<vmem>>, vector<1x32x1xf32>
    %196 = vector.shape_cast %195 : vector<1x32x1xf32> to vector<32x1xf32>
    %197 = vector.broadcast %196 : vector<32x1xf32> to vector<32x128xf32>
    %198 = arith.addf %194, %197 : vector<32x128xf32>
    %199 = arith.addf %138, %191 : vector<32x128xf32>
    %200 = vector.broadcast %3 : vector<1x128xf32> to vector<32x128xf32>
    %201 = arith.mulf %199, %200 : vector<32x128xf32>
    %202 = arith.addf %139, %198 : vector<32x128xf32>
    %c8_i32 = arith.constant 8 : i32
    %203 = tpu.dynamic_rotate %201 by %c8_i32 dim 1 : vector<32x128xf32>, i32 -> vector<32x128xf32>
    %c8_i32_133 = arith.constant 8 : i32
    %204 = vector.broadcast %c8_i32_133 : i32 to vector<32x128xi32>
    %205 = arith.cmpi sge, %13, %204 : vector<32x128xi32>
    %c128_i32_134 = arith.constant 128 : i32
    %206 = vector.broadcast %c128_i32_134 : i32 to vector<32x128xi32>
    %207 = arith.cmpi slt, %13, %206 : vector<32x128xi32>
    %208 = arith.andi %205, %207 : vector<32x128xi1>
    %cst_135 = arith.constant 0.000000e+00 : f32
    %209 = vector.broadcast %cst_135 : f32 to vector<32x128xf32>
    %210 = arith.select %208, %203, %209 : vector<32x128xi1>, vector<32x128xf32>
    %211 = arith.truncf %210 : vector<32x128xf32> to vector<32x128xbf16>
    %c0_136 = arith.constant 0 : index
    %c0_137 = arith.constant 0 : index
    %212 = vector.load %arg17[%c0_136, %c0_137] : memref<96x128xbf16, #tpu.memory_space<vmem>>, vector<32x128xbf16>
    tpu.vector_store %arg17[%c0_136, %c0_137], %211 {strides = array<i32>} : memref<96x128xbf16, #tpu.memory_space<vmem>>, vector<32x128xbf16>,
    %213 = arith.truncf %201 : vector<32x128xf32> to vector<32x128xbf16>
    %c32_138 = arith.constant 32 : index
    %c0_139 = arith.constant 0 : index
    %214 = vector.load %arg17[%c32_138, %c0_139] : memref<96x128xbf16, #tpu.memory_space<vmem>>, vector<32x128xbf16>
    tpu.vector_store %arg17[%c32_138, %c0_139], %213 {strides = array<i32>} : memref<96x128xbf16, #tpu.memory_space<vmem>>, vector<32x128xbf16>,
    %c120_i32 = arith.constant 120 : i32
    %215 = tpu.dynamic_rotate %201 by %c120_i32 dim 1 : vector<32x128xf32>, i32 -> vector<32x128xf32>
    %c0_i32_140 = arith.constant 0 : i32
    %216 = vector.broadcast %c0_i32_140 : i32 to vector<32x128xi32>
    %217 = arith.cmpi sge, %13, %216 : vector<32x128xi32>
    %c120_i32_141 = arith.constant 120 : i32
    %218 = vector.broadcast %c120_i32_141 : i32 to vector<32x128xi32>
    %219 = arith.cmpi slt, %13, %218 : vector<32x128xi32>
    %220 = arith.andi %217, %219 : vector<32x128xi1>
    %cst_142 = arith.constant 0.000000e+00 : f32
    %221 = vector.broadcast %cst_142 : f32 to vector<32x128xf32>
    %222 = arith.select %220, %215, %221 : vector<32x128xi1>, vector<32x128xf32>
    %223 = arith.truncf %222 : vector<32x128xf32> to vector<32x128xbf16>
    %c64_143 = arith.constant 64 : index
    %c0_144 = arith.constant 0 : index
    %224 = vector.load %arg17[%c64_143, %c0_144] : memref<96x128xbf16, #tpu.memory_space<vmem>>, vector<32x128xbf16>
    tpu.vector_store %arg17[%c64_143, %c0_144], %223 {strides = array<i32>} : memref<96x128xbf16, #tpu.memory_space<vmem>>, vector<32x128xbf16>,
    %c0_145 = arith.constant 0 : index
    %c0_146 = arith.constant 0 : index
    %225 = vector.load %arg17[%c0_145, %c0_146] : memref<96x128xbf16, #tpu.memory_space<vmem>>, vector<96x128xbf16>
    %c3 = arith.constant 3 : index
    %c0_147 = arith.constant 0 : index
    %c0_148 = arith.constant 0 : index
    %226 = vector.load %arg6[%c3, %c0_147, %c0_148] : memref<4x32x96xbf16, #tpu.memory_space<vmem>>, vector<1x32x96xbf16>
    %227 = vector.shape_cast %226 : vector<1x32x96xbf16> to vector<32x96xbf16>
    %cst_149 = arith.constant dense<0.000000e+00> : vector<32x128xf32>
    %228 = tpu.matmul %227, %225, %cst_149 {dimension_numbers = #tpu.dot_dimension_numbers<[1], [0], [0], [1], [0, 0, 1, 1], [], []>} : vector<32x96xbf16>, vector<96x128xbf16>, vector<32x128xf32> -> vector<32x128xf32>
    %c3_150 = arith.constant 3 : index
    %c0_151 = arith.constant 0 : index
    %c0_152 = arith.constant 0 : index
    %229 = vector.load %arg8[%c3_150, %c0_151, %c0_152] : memref<4x32x1xf32, #tpu.memory_space<vmem>>, vector<1x32x1xf32>
    %230 = vector.shape_cast %229 : vector<1x32x1xf32> to vector<32x1xf32>
    %231 = vector.broadcast %230 : vector<32x1xf32> to vector<32x128xf32>
    %232 = arith.addf %228, %231 : vector<32x128xf32>
    %c3_153 = arith.constant 3 : index
    %c0_154 = arith.constant 0 : index
    %c0_155 = arith.constant 0 : index
    %233 = vector.load %arg7[%c3_153, %c0_154, %c0_155] : memref<4x32x96xbf16, #tpu.memory_space<vmem>>, vector<1x32x96xbf16>
    %234 = vector.shape_cast %233 : vector<1x32x96xbf16> to vector<32x96xbf16>
    %cst_156 = arith.constant dense<0.000000e+00> : vector<32x128xf32>
    %235 = tpu.matmul %234, %225, %cst_156 {dimension_numbers = #tpu.dot_dimension_numbers<[1], [0], [0], [1], [0, 0, 1, 1], [], []>} : vector<32x96xbf16>, vector<96x128xbf16>, vector<32x128xf32> -> vector<32x128xf32>
    %c3_157 = arith.constant 3 : index
    %c0_158 = arith.constant 0 : index
    %c0_159 = arith.constant 0 : index
    %236 = vector.load %arg9[%c3_157, %c0_158, %c0_159] : memref<4x32x1xf32, #tpu.memory_space<vmem>>, vector<1x32x1xf32>
    %237 = vector.shape_cast %236 : vector<1x32x1xf32> to vector<32x1xf32>
    %238 = vector.broadcast %237 : vector<32x1xf32> to vector<32x128xf32>
    %239 = arith.addf %235, %238 : vector<32x128xf32>
    %240 = math.tanh %232 : vector<32x128xf32>
    %241 = arith.negf %239 : vector<32x128xf32>
    %242 = math.exp %241 : vector<32x128xf32>
    %cst_160 = arith.constant 1.000000e+00 : f32
    %243 = vector.broadcast %cst_160 : f32 to vector<32x128xf32>
    %244 = arith.addf %243, %242 : vector<32x128xf32>
    %245 = arith.divf %243, %244 : vector<32x128xf32>
    %246 = arith.mulf %240, %245 : vector<32x128xf32>
    %247 = arith.truncf %246 : vector<32x128xf32> to vector<32x128xbf16>
    %c3_161 = arith.constant 3 : index
    %c0_162 = arith.constant 0 : index
    %c0_163 = arith.constant 0 : index
    %248 = vector.load %arg11[%c3_161, %c0_162, %c0_163] : memref<4x32x32xbf16, #tpu.memory_space<vmem>>, vector<1x32x32xbf16>
    %249 = vector.shape_cast %248 : vector<1x32x32xbf16> to vector<32x32xbf16>
    %cst_164 = arith.constant dense<0.000000e+00> : vector<32x128xf32>
    %250 = tpu.matmul %249, %247, %cst_164 {dimension_numbers = #tpu.dot_dimension_numbers<[1], [0], [0], [1], [0, 0, 1, 1], [], []>} : vector<32x32xbf16>, vector<32x128xbf16>, vector<32x128xf32> -> vector<32x128xf32>
    %c3_165 = arith.constant 3 : index
    %c0_166 = arith.constant 0 : index
    %c0_167 = arith.constant 0 : index
    %251 = vector.load %arg13[%c3_165, %c0_166, %c0_167] : memref<4x32x1xf32, #tpu.memory_space<vmem>>, vector<1x32x1xf32>
    %252 = vector.shape_cast %251 : vector<1x32x1xf32> to vector<32x1xf32>
    %253 = vector.broadcast %252 : vector<32x1xf32> to vector<32x128xf32>
    %254 = arith.addf %250, %253 : vector<32x128xf32>
    %255 = arith.addf %202, %254 : vector<32x128xf32>
    %256 = vector.broadcast %3 : vector<1x128xf32> to vector<32x128xf32>
    %257 = arith.mulf %255, %256 : vector<32x128xf32>
    %c0_168 = arith.constant 0 : index
    %c0_169 = arith.constant 0 : index
    %258 = vector.load %arg14[%c0_168, %c0_169] : memref<8x32xbf16, #tpu.memory_space<vmem>>, vector<8x32xbf16>
    %259 = arith.truncf %257 : vector<32x128xf32> to vector<32x128xbf16>
    %cst_170 = arith.constant dense<0.000000e+00> : vector<8x128xf32>
    %260 = tpu.matmul %258, %259, %cst_170 {dimension_numbers = #tpu.dot_dimension_numbers<[1], [0], [0], [1], [0, 0, 1, 1], [], []>} : vector<8x32xbf16>, vector<32x128xbf16>, vector<8x128xf32> -> vector<8x128xf32>
    %c0_171 = arith.constant 0 : index
    %c0_172 = arith.constant 0 : index
    %261 = vector.load %arg15[%c0_171, %c0_172] : memref<8x1xf32, #tpu.memory_space<vmem>>, vector<8x1xf32>
    %262 = vector.broadcast %261 : vector<8x1xf32> to vector<8x128xf32>
    %263 = arith.addf %260, %262 : vector<8x128xf32>
    %264 = vector.broadcast %3 : vector<1x128xf32> to vector<8x128xf32>
    %265 = arith.mulf %263, %264 : vector<8x128xf32>
    %c0_173 = arith.constant 0 : index
    %c0_174 = arith.constant 0 : index
    %c0_175 = arith.constant 0 : index
    %266 = vector.load %arg2[%c0_173, %c0_174, %c0_175] : memref<1x8x128xf32, #tpu.memory_space<vmem>>, vector<1x8x128xf32>
    %267 = vector.shape_cast %266 : vector<1x8x128xf32> to vector<8x128xf32>
    %268 = vector.broadcast %3 : vector<1x128xf32> to vector<8x128xf32>
    %269 = arith.mulf %267, %268 : vector<8x128xf32>
    %270 = arith.addf %265, %269 : vector<8x128xf32>
    %c0_176 = arith.constant 0 : index
    %c0_177 = arith.constant 0 : index
    %c0_178 = arith.constant 0 : index
    %271 = vector.load %arg16[%c0_176, %c0_177, %c0_178] : memref<1x8x128xf32, #tpu.memory_space<vmem>>, vector<1x8x128xf32>
    %272 = vector.shape_cast %271 : vector<1x8x128xf32> to vector<8x128xf32>
    %273 = vector.shape_cast %270 : vector<8x128xf32> to vector<1x8x128xf32>
    tpu.vector_store %arg16[%c0_176, %c0_177, %c0_178], %273 {strides = array<i32>} : memref<1x8x128xf32, #tpu.memory_space<vmem>>, vector<1x8x128xf32>,
    return
  }
  func.func @transform_0(%arg0: i32) -> (i32, i32, i32) {
    %c0_i32 = arith.constant 0 : i32
    %c0_i32_0 = arith.constant 0 : i32
    %c0_i32_1 = arith.constant 0 : i32
    return %arg0, %c0_i32, %c0_i32_0 : i32, i32, i32
  }
  func.func @transform_1(%arg0: i32) -> (i32, i32, i32) {
    %c0_i32 = arith.constant 0 : i32
    %c0_i32_0 = arith.constant 0 : i32
    %c0_i32_1 = arith.constant 0 : i32
    return %arg0, %c0_i32, %c0_i32_0 : i32, i32, i32
  }
  func.func @transform_2(%arg0: i32) -> (i32, i32, i32) {
    %c0_i32 = arith.constant 0 : i32
    %c0_i32_0 = arith.constant 0 : i32
    %c0_i32_1 = arith.constant 0 : i32
    return %arg0, %c0_i32, %c0_i32_0 : i32, i32, i32
  }
  func.func @transform_3(%arg0: i32) -> (i32, i32) {
    %c0_i32 = arith.constant 0 : i32
    %c0_i32_0 = arith.constant 0 : i32
    %c0_i32_1 = arith.constant 0 : i32
    return %c0_i32, %c0_i32_0 : i32, i32
  }
  func.func @transform_4(%arg0: i32) -> (i32, i32) {
    %c0_i32 = arith.constant 0 : i32
    %c0_i32_0 = arith.constant 0 : i32
    %c0_i32_1 = arith.constant 0 : i32
    return %c0_i32, %c0_i32_0 : i32, i32
  }
  func.func @transform_5(%arg0: i32) -> (i32, i32, i32) {
    %c0_i32 = arith.constant 0 : i32
    %c0_i32_0 = arith.constant 0 : i32
    %c0_i32_1 = arith.constant 0 : i32
    %c0_i32_2 = arith.constant 0 : i32
    return %c0_i32, %c0_i32_0, %c0_i32_1 : i32, i32, i32
  }
  func.func @transform_6(%arg0: i32) -> (i32, i32, i32) {
    %c0_i32 = arith.constant 0 : i32
    %c0_i32_0 = arith.constant 0 : i32
    %c0_i32_1 = arith.constant 0 : i32
    %c0_i32_2 = arith.constant 0 : i32
    return %c0_i32, %c0_i32_0, %c0_i32_1 : i32, i32, i32
  }
  func.func @transform_7(%arg0: i32) -> (i32, i32, i32) {
    %c0_i32 = arith.constant 0 : i32
    %c0_i32_0 = arith.constant 0 : i32
    %c0_i32_1 = arith.constant 0 : i32
    %c0_i32_2 = arith.constant 0 : i32
    return %c0_i32, %c0_i32_0, %c0_i32_1 : i32, i32, i32
  }
  func.func @transform_8(%arg0: i32) -> (i32, i32, i32) {
    %c0_i32 = arith.constant 0 : i32
    %c0_i32_0 = arith.constant 0 : i32
    %c0_i32_1 = arith.constant 0 : i32
    %c0_i32_2 = arith.constant 0 : i32
    return %c0_i32, %c0_i32_0, %c0_i32_1 : i32, i32, i32
  }
  func.func @transform_9(%arg0: i32) -> (i32, i32, i32) {
    %c0_i32 = arith.constant 0 : i32
    %c0_i32_0 = arith.constant 0 : i32
    %c0_i32_1 = arith.constant 0 : i32
    %c0_i32_2 = arith.constant 0 : i32
    return %c0_i32, %c0_i32_0, %c0_i32_1 : i32, i32, i32
  }
  func.func @transform_10(%arg0: i32) -> (i32, i32, i32) {
    %c0_i32 = arith.constant 0 : i32
    %c0_i32_0 = arith.constant 0 : i32
    %c0_i32_1 = arith.constant 0 : i32
    %c0_i32_2 = arith.constant 0 : i32
    return %c0_i32, %c0_i32_0, %c0_i32_1 : i32, i32, i32
  }
  func.func @transform_11(%arg0: i32) -> (i32, i32, i32) {
    %c0_i32 = arith.constant 0 : i32
    %c0_i32_0 = arith.constant 0 : i32
    %c0_i32_1 = arith.constant 0 : i32
    %c0_i32_2 = arith.constant 0 : i32
    return %c0_i32, %c0_i32_0, %c0_i32_1 : i32, i32, i32
  }
  func.func @transform_12(%arg0: i32) -> (i32, i32, i32) {
    %c0_i32 = arith.constant 0 : i32
    %c0_i32_0 = arith.constant 0 : i32
    %c0_i32_1 = arith.constant 0 : i32
    %c0_i32_2 = arith.constant 0 : i32
    return %c0_i32, %c0_i32_0, %c0_i32_1 : i32, i32, i32
  }
  func.func @transform_13(%arg0: i32) -> (i32, i32) {
    %c0_i32 = arith.constant 0 : i32
    %c0_i32_0 = arith.constant 0 : i32
    %c0_i32_1 = arith.constant 0 : i32
    return %c0_i32, %c0_i32_0 : i32, i32
  }
  func.func @transform_14(%arg0: i32) -> (i32, i32) {
    %c0_i32 = arith.constant 0 : i32
    %c0_i32_0 = arith.constant 0 : i32
    %c0_i32_1 = arith.constant 0 : i32
    return %c0_i32, %c0_i32_0 : i32, i32
  }
  func.func @transform_15(%arg0: i32) -> (i32, i32, i32) {
    %c0_i32 = arith.constant 0 : i32
    %c0_i32_0 = arith.constant 0 : i32
    %c0_i32_1 = arith.constant 0 : i32
    return %arg0, %c0_i32, %c0_i32_0 : i32, i32, i32
  }
}

</mosaic_0001>

<bundles_post_ra>
// kernel: tpu_custom_call.1
= control target key start
LH: loop header
LB: loop body
LE: loop exit
PB: predicated region body
PF: predicated region fallthrough
CT: control target
= control target key end

     0   :  { %s4223_s0 = inlined_call_operand.vmem [shape: f32[4,8,128], index: 0, kind: input, shape index: {}]   ;;  %s4224_s1 = inlined_call_operand.vmem [shape: f32[4,8,128], index: 1, kind: input, shape index: {}]   ;;  %s4225_s2 = inlined_call_operand.vmem [shape: f32[4,1,128], index: 2, kind: input, shape index: {}]   ;;  %s4226_s3 = inlined_call_operand.vmem [shape: bf16[32,8], index: 3, kind: input, shape index: {}]   ;;  %s4227_s4 = inlined_call_operand.vmem [shape: f32[32,1], index: 4, kind: input, shape index: {}]   ;;  %s4228_s5 = inlined_call_operand.vmem [shape: bf16[4,32,96], index: 5, kind: input, shape index: {}]   ;;  %s4229_s6 = inlined_call_operand.vmem [shape: bf16[4,32,96], index: 6, kind: input, shape index: {}]   ;;  %s4230_s7 = inlined_call_operand.vmem [shape: f32[4,32,1], index: 7, kind: input, shape index: {}]   ;;  %s4231_s8 = inlined_call_operand.vmem [shape: f32[4,32,1], index: 8, kind: input, shape index: {}]   ;;  %s4232_s9 = inlined_call_operand.vmem [shape: bf16[4,32,32], index: 9, kind: input, shape index: {}]   ;;  %s4233_s10 = inlined_call_operand.vmem [shape: bf16[4,32,32], index: 10, kind: input, shape index: {}]   ;;  %s4234_s11 = inlined_call_operand.vmem [shape: f32[4,32,1], index: 11, kind: input, shape index: {}]   ;;  %s4235_s12 = inlined_call_operand.vmem [shape: f32[4,32,1], index: 12, kind: input, shape index: {}]   ;;  %s4236_s13 = inlined_call_operand.vmem [shape: bf16[8,32], index: 13, kind: input, shape index: {}]   ;;  %s4237_s14 = inlined_call_operand.vmem [shape: f32[8,1], index: 14, kind: input, shape index: {}]   ;;  %s4238_s15 = inlined_call_operand.hbm [shape: f32[4,8,128], index: 15, kind: output, shape index: {}]  }
   0x1   :  { %4245 = sst [smem:[#allocation11_spill]] %s4223_s0 }
   0x2   :  { %20 = vsyncpa [#allocation4], 0 }
   0x3   :  { %22 = vsyncpa [#allocation4 + $0x1], 0  ;;  %s3590_s18 = smov 0   ;;  %s3592_s19 = smov 0  }
   0x4   :  { %s3594_s20 = smov 0   ;;  %s3596_s21 = smov 0  }
   0x5 LB: > { %4246 = sst [smem:[#allocation6_spill]] %s3484_s18  ;;  %s3611_s22 = sadd.s32 4294967295, %s3496_s21   ;;  %s3496_s21 = sphi %s3596_s21, %s4265_s21   ;;  %s3492_s20 = sphi %s3594_s20, %s4267_s20   ;;  %s3488_s19 = sphi %s3592_s19, %s4269_s19   ;;  %s3484_s18 = sphi %s3590_s18, %s4268_s18  }
   0x6   : > { %4247 = sst [smem:[#allocation7_spill]] %s3492_s20  ;;  %s2571_s23 = sadd.s32 4294967294, %s3496_s21  }
   0x7   : > { %s3615_s24 = sadd.s32 1, %s3496_s21   ;;  %s365_s25 = sadd.s32 1, %s3492_s20 }
   0x8   : > { %4248 = sst [smem:[#allocation8_spill]] %s3615_s24  ;;  %s362_s26 = ssub.s32 %s3496_s21, %s3615_s24 }
   0x9   : > { %p375_p0 = scmp.ne.s32.totalorder %s3492_s20, %s3488_s19  ;;  %p363_p1 = scmp.eq.s32.totalorder %s362_s26, 0 }
   0xa   : > { %p376_p2 = scmp.eq.s32.totalorder %s3611_s22, 3  ;;  %p381_p3 = scmp.ne.s32.totalorder %s3488_s19, %s3484_s18 }
   0xb   : > { %p382_p4 = scmp.eq.s32.totalorder %s2571_s23, 3  ;;  %p2574_p7 = scmp.ge.s32.totalorder %s3496_s21, 1 }
   0xc   : > { %s3626_s27 = scalar_select %p363_p1, %s3492_s20, %s365_s25  }
   0xd   : > { %p3628_p5 = por %p376_p2, %p375_p0  ;;  %p3632_p6 = por %p382_p4, %p381_p3 }
   0xe   : > { %4249 = sst [smem:[#allocation9_spill]] %s3626_s27  ;;  %p456_p8 = scmp.lt.s32.totalorder %s3496_s21, 5 }
   0xf   : > { %s4251_s29 = scalar_select %p3632_p6, 1, 0 }
  0x10   : > { %p457_p9 = pnand %p2574_p7, %p456_p8 }
  0x11   : > { %4252 = sst [smem:[#allocation10_spill]] %s4251_s29  ;;  %p510_p10 = scmp.lt.s32.totalorder (!%p457_p9), %s3611_s22, 3  ;;  %v3305_v0 = vld [vmem:[%s4226_s3] sm:$0xff] (!%p457_p9)   ;;  %vm563_vm0 = vcmask (!%p457_p9), 64512   ;;  %v531_v2 = vld [vmem:[%s4227_s4 + $0x10] sm:$0xff] (!%p457_p9)  ;;  %v3498_v3 = vmov (!%p457_p9), 0   ;;  %v633_v43 = vlaneseq (!%p457_p9) }
  0x12   : > { %460 = sbr.rel (%p457_p9) target bundleno = 2986 (0xbaa), region = 80  ;;  %v529_v1 = vld [vmem:[%s4227_s4] sm:$0xff] (!%p457_p9)  ;;  %2948 = vmatprep.mubr.msk.bf16.mxu0 (!%p457_p9), %vm563_vm0, %v3305_v0  ;;  %3223 = vset.pattern.permute.xlu0 (!%p457_p9), %v3498_v3  ;;  %s4253_s0 = sld [smem:[#allocation11_spill]] (!%p457_p9)  ;;  %v530_v4 = vld [vmem:[%s4227_s4 + $0x8] sm:$0xff] (!%p457_p9)  ;;  %vm570_vm1 = vcmask (!%p457_p9), 1043456   ;;  %v532_v6 = vld [vmem:[%s4227_s4 + $0x18] sm:$0xff] (!%p457_p9) }
  0x13   : > { %535 = vperm.xlu0 (!%p457_p9), %3223, %v529_v1   ;;  %3224 = vset.pattern.permute.xlu1 (!%p457_p9), %v3498_v3  ;;  %v3306_v9 = vld [vmem:[%s4226_s3 + $0x8] sm:$0xff] (!%p457_p9)   ;;  %s3499_s18 = smov (!%p457_p9), 1   ;;  %s3500_s29 = smov (!%p457_p9), 127   ;;  %v781_v30 = vld [vmem:[%s4231_s8] sm:$0xff] (!%p457_p9)  ;;  %v784_v31 = vld [vmem:[%s4231_s8 + $0x18] sm:$0xff] (!%p457_p9)  ;;  %vm721_vm2 = vcmask (!%p457_p9), 785408  }
  0x14   : > { %545 = vperm.xlu1 (!%p457_p9), %3224, %v531_v2   ;;  %v782_v29 = vld [vmem:[%s4231_s8 + $0x8] sm:$0xff] (!%p457_p9)  ;;  %v783_v32 = vld [vmem:[%s4231_s8 + $0x10] sm:$0xff] (!%p457_p9)  ;;  %v3307_v34 = vld [vmem:[%s4228_s5] sm:$0xff] (!%p457_p9)   ;;  %v3737_v44 = vand.u32 (!%p457_p9), 127, %v633_v43  ;;  %vm942_vm7 = vcmask (!%p457_p9), 261120   ;;  %s3501_s23 = smov (!%p457_p9), 2  }
  0x15   : > { %v688_v33 = vld [vmem:[%s4230_s7 + $0x8] sm:$0xff] (!%p457_p9)  ;;  %v3308_v35 = vld [vmem:[%s4229_s6] sm:$0xff] (!%p457_p9)   ;;  %2964 = vmatprep.mubr.msk.bf16.mxu1 (!%p457_p9), %vm721_vm2, %v3307_v34  ;;  %v690_v37 = vld [vmem:[%s4230_s7 + $0x18] sm:$0xff] (!%p457_p9)  ;;  %s3502_s25 = smov (!%p457_p9), 126   ;;  %s3503_s27 = smov (!%p457_p9), 4  }
  0x16   : > { %v687_v36 = vld [vmem:[%s4230_s7] sm:$0xff] (!%p457_p9)  ;;  %v689_v38 = vld [vmem:[%s4230_s7 + $0x10] sm:$0xff] (!%p457_p9)  ;;  %v909_v39 = vld [vmem:[%s4234_s11 + $0x8] sm:$0xff] (!%p457_p9)  ;;  %vm643_vm3 = vcmp.ge.s32.totalorder (!%p457_p9), %v3737_v44, 1  ;;  %vm667_vm5 = vcmp.lt.s32.totalorder (!%p457_p9), %v3737_v44, 127  ;;  %vm1111_vm8 = vcmp.ge.s32.totalorder (!%p457_p9), %v3737_v44, 2 }
  0x17   : > { %540 = vperm.xlu0 (!%p457_p9), %3223, %v530_v4   ;;  %v908_v40 = vld [vmem:[%s4234_s11] sm:$0xff] (!%p457_p9)  ;;  %v911_v41 = vld [vmem:[%s4234_s11 + $0x18] sm:$0xff] (!%p457_p9)  ;;  %v910_v42 = vld [vmem:[%s4234_s11 + $0x10] sm:$0xff] (!%p457_p9)  ;;  %vm1133_vm10 = vcmp.lt.s32.totalorder (!%p457_p9), %v3737_v44, 126  ;;  %s3504_s26 = smov (!%p457_p9), 124   ;;  %vm1583_vm12 = vcmp.ge.s32.totalorder (!%p457_p9), %v3737_v44, 4 }
  0x18   : > { %550 = vperm.xlu1 (!%p457_p9), %3224, %v532_v6   ;;  %vm2752_vm4 = vmpackc.low (!%p457_p9), %vm643_vm3, %vm643_vm3  ;;  %v3309_v0 = vld [vmem:[%s4228_s5 + $0x8] sm:$0xff] (!%p457_p9)   ;;  %v3311_v2 = vld [vmem:[%s4232_s9] sm:$0xff] (!%p457_p9)   ;;  %vm1605_vm14 = vcmp.lt.s32.totalorder (!%p457_p9), %v3737_v44, 124  ;;  %s3506_s30 = smov (!%p457_p9), 120   ;;  %vm2077_vm3 = vcmp.lt.s32.totalorder (!%p457_p9), %v3737_v44, 120 }
  0x19   : > { %s3643_s17 = scalar_select %p510_p10, %s3611_s22, 3  ;;  %vm3745_vm6 = vmpackc.low %vm667_vm5, %vm667_vm5  ;;  %v3310_v1 = vld [vmem:[%s4229_s6 + $0x8] sm:$0xff]  }
  0x1a   : > { %v3312_v59 = vld [vmem:[%s4232_s9 + $0x8] sm:$0xff]   ;;  %vm2776_vm9 = vmpackc.low %vm1111_vm8, %vm1111_vm8 }
  0x1b   : > { %s4244_s20 = sshll.u32 %s3643_s17, 3  ;;  %s3672_s16 = scalar_lea.vmem %s4225_s2, %s3643_s17  ;;  %vm3859_vm11 = vmpackc.low %vm1133_vm10, %vm1133_vm10 }
  0x1c   : > { %s513_s24 = scalar_lea.vmem %s4253_s0, %s4244_s20  ;;  %v3675_v16 = vld [vmem:[%s3672_s16] ss:$0 sm:$0xff]  ;;  %vm2800_vm13 = vmpackc.low %vm1583_vm12, %vm1583_vm12 }
  0x1d   : > { %v522_v5 = vld [vmem:[%s513_s24] sm:$0xff]  ;;  %vm3973_vm15 = vmpackc.low %vm1605_vm14, %vm1605_vm14  ;;  %s3505_s24 = smov 8  }
  0x1e   : > { %v528_v7 = vpack.c.bf16 %v522_v5, %v522_v5 }
  0x20   : > { %3172 = vmatprep.subr.msk.bf16.mxu0 %vm570_vm1, %v528_v7  ;;  %v572_v8 = vsel %vm570_vm1, %v528_v7, 0 }
  0x21   : > { %2947 = vmatpush3.bf16.msra.mxu0 %v572_v8 }
  0x24   : > { %2949 = vmatmul.mubr.msk.bf16.vlgmr.msra.gmra.mrb[0].mxu0 %vm563_vm0, %v3306_v9  ;;  %vm2055_vm0 = vcmp.ge.s32.totalorder %v3737_v44, 8 }
  0x25   : > { %2980 = vmatprep.mubr.msk.bf16.mxu0 %vm721_vm2, %v3308_v35  ;;  %vm2824_vm1 = vmpackc.low %vm2055_vm0, %vm2055_vm0 }
  0x92   : > { %v536_v11 = vpop.permute.xlu0 %535 }
  0x93   : > { %v546_v10 = vpop.permute.xlu1 %545 }
  0x96   : > { %v541_v19 = vpop.permute.xlu0 %540 }
  0x97   : > { %v551_v13 = vpop.permute.xlu1 %550 }
  0xf7   : > { %v2950_v12 = vpop.f32.mrb[0].mxu0 }
  0xf8   : > { %v617_v14 = vadd.f32 %v2950_v12, %v546_v10  ;;  %v608_v15 = vpop.f32.mrb[1].mxu0 }
  0xf9   : > { %v609_v17 = vadd.f32 %v608_v15, %v536_v11  ;;  %v2951_v18 = vpop.f32.mrb[2].mxu0 }
  0xfa   : > { %v620_v20 = vadd.f32 %v2951_v18, %v551_v13  ;;  %v611_v21 = vpop.f32.mrb[3].mxu0  ;;  %v3678_v23 = vmul.f32 %v3675_v16, %v617_v14 }
  0xfb   : > { %v612_v22 = vadd.f32 %v611_v21, %v541_v19  ;;  %v3684_v25 = vmul.f32 %v3675_v16, %v609_v17 }
  0xfc   : > { %v3681_v24 = vmul.f32 %v3675_v16, %v620_v20 }
  0xfd   : > { %v3687_v26 = vmul.f32 %v3675_v16, %v612_v22 }
  0xfe   : > { %v3230_v27 = vpack.i.bf16 %v3681_v24, %v3678_v23  ;;  %v655_v57 = vpack.c.bf16 %v3681_v24, %v3678_v23 }
  0xff   : > { %v3225_v28 = vpack.i.bf16 %v3687_v26, %v3684_v25  ;;  %v654_v53 = vpack.c.bf16 %v3687_v26, %v3684_v25 }
 0x100   : > { %3231 = vrot.lane.b32.xlu1 %v3230_v27, %s3499_s18 }
 0x101   : > { %3226 = vrot.lane.b32.xlu0 %v3225_v28, %s3499_s18 }
 0x104   : > { %3241 = vrot.lane.b32.xlu1 %v3230_v27, %s3500_s29 }
 0x105   : > { %3236 = vrot.lane.b32.xlu0 %v3225_v28, %s3500_s29  ;;  %s2749_s29 = sshll.u32 %s3611_s22, 7  ;;  %s3509_s22 = smov [#allocation3]  }
 0x106   : > { %s3438_s0 = sshll.u32 %s3509_s22, 4  ;;  %s3439_s0 = int_to_ptr.vmem [resolvable:$false] %s3438_s0 }
 0x108   : > { %792 = vperm.xlu1 %3224, %v782_v29  }
 0x109   : > { %787 = vperm.xlu0 %3223, %v781_v30  }
 0x10c   : > { %802 = vperm.xlu1 %3224, %v784_v31  }
 0x10d   : > { %797 = vperm.xlu0 %3223, %v783_v32  }
 0x110   : > { %698 = vperm.xlu1 %3224, %v688_v33  }
 0x111   : > { %693 = vperm.xlu0 %3223, %v687_v36  }
 0x114   : > { %708 = vperm.xlu1 %3224, %v690_v37  }
 0x115   : > { %703 = vperm.xlu0 %3223, %v689_v38  }
 0x118   : > { %919 = vperm.xlu1 %3224, %v909_v39  }
 0x119   : > { %914 = vperm.xlu0 %3223, %v908_v40  }
 0x11c   : > { %929 = vperm.xlu1 %3224, %v911_v41  }
 0x11d   : > { %924 = vperm.xlu0 %3223, %v910_v42  }
 0x172   : > { %v3232_v45 = vpop.permute.xlu1 %3231 }
 0x173   : > { %v3227_v46 = vpop.permute.xlu0 %3226  ;;  %v3234_v47 = vunpack.i.h.bf16 %v3232_v45  ;;  %v3233_v48 = vunpack.i.l.bf16 %v3232_v45 }
 0x174   : > { %v3229_v49 = vunpack.i.h.bf16 %v3227_v46  ;;  %v3228_v50 = vunpack.i.l.bf16 %v3227_v46 }
 0x175   : > { %v2756_v52 = vpack.c.bf16 %v3234_v47, %v3233_v48 }
 0x176   : > { %v2753_v51 = vpack.c.bf16 %v3229_v49, %v3228_v50  ;;  %v3242_v58 = vpop.permute.xlu1 %3241 }
 0x177   : > { %v3237_v54 = vpop.permute.xlu0 %3236  ;;  %v3244_v60 = vunpack.i.h.bf16 %v3242_v58  ;;  %v3243_v61 = vunpack.i.l.bf16 %v3242_v58 }
 0x178   : > { %2952 = vmatprep.subr.msk.bf16.mxu1 %vm2752_vm4, %v2753_v51  ;;  %2968 = vmatprep.subr.msk.bf16.mxu0 %vm2752_vm4, %v2753_v51  ;;  %v3239_v55 = vunpack.i.h.bf16 %v3237_v54  ;;  %v3238_v56 = vunpack.i.l.bf16 %v3237_v54 }
 0x179   : > { %2953 = vmatpush3.bf16.msk.msra.mxu1 %vm2752_vm4, %v2753_v51  ;;  %2969 = vmatpush3.bf16.msk.msra.mxu0 %vm2752_vm4, %v2753_v51  ;;  %v2762_v63 = vpack.c.bf16 %v3244_v60, %v3243_v61 }
 0x17a   : > { %2954 = vmatprep.subr.msk.bf16.mxu1 %vm2752_vm4, %v2756_v52  ;;  %2970 = vmatprep.subr.msk.bf16.mxu0 %vm2752_vm4, %v2756_v52  ;;  %v2759_v62 = vpack.c.bf16 %v3239_v55, %v3238_v56 }
 0x17d   : > { %2955 = vmatpush3.bf16.msk.msra.mxu1 %vm2752_vm4, %v2756_v52  ;;  %2971 = vmatpush3.bf16.msk.msra.mxu0 %vm2752_vm4, %v2756_v52  ;;  %vm4123_vm4 = vmpackc.low %vm2077_vm3, %vm2077_vm3 }
 0x17e   : > { %2956 = vmatprep.subr.bf16.mxu1 %v654_v53  ;;  %2972 = vmatprep.subr.bf16.mxu0 %v654_v53 }
 0x181   : > { %2957 = vmatpush3.bf16.msra.mxu1 %v654_v53  ;;  %2973 = vmatpush3.bf16.msra.mxu0 %v654_v53 }
 0x182   : > { %2958 = vmatprep.subr.bf16.mxu1 %v655_v57  ;;  %2974 = vmatprep.subr.bf16.mxu0 %v655_v57 }
 0x185   : > { %2959 = vmatpush3.bf16.msra.mxu1 %v655_v57  ;;  %2975 = vmatpush3.bf16.msra.mxu0 %v655_v57 }
 0x186   : > { %2960 = vmatprep.subr.msk.bf16.mxu1 %vm3745_vm6, %v2759_v62  ;;  %2976 = vmatprep.subr.msk.bf16.mxu0 %vm3745_vm6, %v2759_v62 }
 0x187   : > { %v793_v3 = vpop.permute.xlu1 %792 }
 0x188   : > { %v788_v4 = vpop.permute.xlu0 %787 }
 0x189   : > { %2961 = vmatpush3.bf16.msk.msra.mxu1 %vm3745_vm6, %v2759_v62  ;;  %2977 = vmatpush3.bf16.msk.msra.mxu0 %vm3745_vm6, %v2759_v62 }
 0x18a   : > { %2962 = vmatprep.subr.msk.bf16.mxu1 %vm3745_vm6, %v2762_v63  ;;  %2978 = vmatprep.subr.msk.bf16.mxu0 %vm3745_vm6, %v2762_v63 }
 0x18b   : > { %v803_v5 = vpop.permute.xlu1 %802 }
 0x18c   : > { %v798_v6 = vpop.permute.xlu0 %797 }
 0x18d   : > { %2963 = vmatpush3.bf16.msk.msra.mxu1 %vm3745_vm6, %v2762_v63  ;;  %2979 = vmatpush3.bf16.msk.msra.mxu0 %vm3745_vm6, %v2762_v63 }
 0x18f   : > { %v699_v29 = vpop.permute.xlu1 %698 }
 0x190   : > { %2965 = vmatmul.mubr.msk.bf16.vlgmr.msra.gmra.mrb[0].mxu1 %vm721_vm2, %v3309_v0  ;;  %2981 = vmatmul.mubr.msk.bf16.vlgmr.msra.gmra.mrb[4].mxu0 %vm721_vm2, %v3310_v1  ;;  %v694_v22 = vpop.permute.xlu0 %693 }
 0x191   : > { %2988 = vmatprep.mubr.msk.bf16.mxu1 %vm942_vm7, %v3311_v2 }
 0x193   : > { %v709_v34 = vpop.permute.xlu1 %708 }
 0x194   : > { %v704_v30 = vpop.permute.xlu0 %703 }
 0x197   : > { %v920_v61 = vpop.permute.xlu1 %919 }
 0x198   : > { %v915_v60 = vpop.permute.xlu0 %914 }
 0x19b   : > { %v930_v2 = vpop.permute.xlu1 %929 }
 0x19c   : > { %v925_v62 = vpop.permute.xlu0 %924 }
 0x263   : > { %v2966_v7 = vpop.f32.mrb[0].mxu1  ;;  %v2982_v8 = vpop.f32.mrb[4].mxu0 }
 0x264   : > { %v864_v9 = vadd.f32 %v2982_v8, %v798_v6  ;;  %v762_v10 = vpop.f32.mrb[1].mxu1  ;;  %v855_v11 = vpop.f32.mrb[5].mxu0  ;;  %v771_v31 = vadd.f32 %v2966_v7, %v704_v30  ;;  %v2609_v30 = vld [vmem:[%s4230_s7 + $0x30] sm:$0xff] }
 0x265   : > { %v856_v12 = vadd.f32 %v855_v11, %v788_v4  ;;  %v2967_v13 = vpop.f32.mrb[2].mxu1  ;;  %v2983_v14 = vpop.f32.mrb[6].mxu0  ;;  %v763_v32 = vadd.f32 %v762_v10, %v694_v22  ;;  %v3315_v22 = vld [vmem:[%s4228_s5 + $0x10] sm:$0xff]  }
 0x266   : > { %v2593_v15 = vmul.f32 -1.442695, %v864_v9  ;;  %v867_v17 = vadd.f32 %v2983_v14, %v803_v5  ;;  %v765_v18 = vpop.f32.mrb[3].mxu1  ;;  %v858_v19 = vpop.f32.mrb[7].mxu0  ;;  %v774_v37 = vadd.f32 %v2967_v13, %v709_v34  ;;  %v3313_v5 = vld [vmem:[%s4233_s10] sm:$0xff]   ;;  %v3314_v9 = vld [vmem:[%s4233_s10 + $0x8] sm:$0xff]  }
 0x267   : > { %v2591_v20 = vmul.f32 -1.442695, %v856_v12  ;;  %v859_v21 = vadd.f32 %v858_v19, %v793_v3  ;;  %v766_v40 = vadd.f32 %v765_v18, %v699_v29  ;;  %2996 = vmatprep.mubr.msk.bf16.mxu0 %vm942_vm7, %v3313_v5  ;;  %v2619_v18 = vld [vmem:[%s4231_s8 + $0x20] sm:$0xff]  ;;  %v2622_v19 = vld [vmem:[%s4231_s8 + $0x38] sm:$0xff]  ;;  %v2637_v34 = vld [vmem:[%s4234_s11 + $0x30] sm:$0xff] }
 0x268   : > { %3337 = vpow2.f32 %v2593_v15  ;;  %v2594_v27 = vmul.f32 -1.442695, %v867_v17  ;;  %v2610_v29 = vld [vmem:[%s4230_s7 + $0x38] sm:$0xff] }
 0x269   : > { %3339 = vpow2.f32 %v2591_v20  ;;  %v2592_v28 = vmul.f32 -1.442695, %v859_v21  ;;  %v2621_v20 = vld [vmem:[%s4231_s8 + $0x30] sm:$0xff]  ;;  %v2608_v21 = vld [vmem:[%s4230_s7 + $0x28] sm:$0xff] }
 0x26a   : > { %3341 = vpow2.f32 %v2594_v27  ;;  %v3316_v27 = vld [vmem:[%s4229_s6 + $0x10] sm:$0xff]  }
 0x26b   : > { %3343 = vpow2.f32 %v2592_v28  ;;  %v2607_v28 = vld [vmem:[%s4230_s7 + $0x20] sm:$0xff] }
 0x26c   : > { %3345 = vtanh.f32 %v771_v31  ;;  %v2636_v31 = vld [vmem:[%s4234_s11 + $0x28] sm:$0xff] }
 0x26d   : > { %3347 = vtanh.f32 %v763_v32  ;;  %v2635_v32 = vld [vmem:[%s4234_s11 + $0x20] sm:$0xff] }
 0x272   : > { %v3338_v33 = vpop.eup %3337 }
 0x273   : > { %v3340_v35 = vpop.eup %3339  ;;  %v888_v36 = vadd.f32 1.0, %v3338_v33  ;;  %v2638_v33 = vld [vmem:[%s4234_s11 + $0x38] sm:$0xff] }
 0x274   : > { %v886_v38 = vadd.f32 1.0, %v3340_v35  ;;  %v3342_v39 = vpop.eup %3341 }
 0x275   : > { %3349 = vrcp.f32 %v888_v36  ;;  %v889_v41 = vadd.f32 1.0, %v3342_v39  ;;  %v3344_v42 = vpop.eup %3343 }
 0x276   : > { %3351 = vrcp.f32 %v886_v38  ;;  %v887_v43 = vadd.f32 1.0, %v3344_v42  ;;  %v3346_v45 = vpop.eup %3345 }
 0x277   : > { %3353 = vtanh.f32 %v774_v37  ;;  %v3348_v46 = vpop.eup %3347 }
 0x278   : > { %3355 = vrcp.f32 %v889_v41 }
 0x279   : > { %3357 = vtanh.f32 %v766_v40 }
 0x27a   : > { %3359 = vrcp.f32 %v887_v43 }
 0x27f   : > { %v3350_v47 = vpop.eup %3349 }
 0x280   : > { %v3352_v48 = vpop.eup %3351  ;;  %v900_v49 = vmul.f32 %v3350_v47, %v3346_v45 }
 0x281   : > { %v3354_v50 = vpop.eup %3353  ;;  %v898_v51 = vmul.f32 %v3352_v48, %v3348_v46 }
 0x282   : > { %v3356_v52 = vpop.eup %3355 }
 0x283   : > { %v3358_v53 = vpop.eup %3357  ;;  %v901_v54 = vmul.f32 %v3356_v52, %v3354_v50  ;;  %v3320_v50 = vld [vmem:[%s4232_s9 + $0x18] sm:$0xff]  }
 0x284   : > { %v3360_v55 = vpop.eup %3359 }
 0x285   : > { %v899_v56 = vmul.f32 %v3360_v55, %v3358_v53  ;;  %v903_v57 = vpack.c.bf16 %v901_v54, %v900_v49  ;;  %v3317_v55 = vld [vmem:[%s4228_s5 + $0x18] sm:$0xff]  }
 0x287   : > { %v902_v58 = vpack.c.bf16 %v899_v56, %v898_v51  ;;  %v3318_v56 = vld [vmem:[%s4229_s6 + $0x18] sm:$0xff]  }
 0x289   : > { %2984 = vmatprep.subr.bf16.mxu1 %v902_v58  ;;  %2992 = vmatprep.subr.bf16.mxu0 %v902_v58 }
 0x28a   : > { %2985 = vmatpush3.bf16.msra.mxu1 %v902_v58  ;;  %2993 = vmatpush3.bf16.msra.mxu0 %v902_v58 }
 0x28b   : > { %2986 = vmatprep.subr.bf16.mxu1 %v903_v57  ;;  %2994 = vmatprep.subr.bf16.mxu0 %v903_v57 }
 0x28e   : > { %2987 = vmatpush3.bf16.msra.mxu1 %v903_v57  ;;  %2995 = vmatpush3.bf16.msra.mxu0 %v903_v57  ;;  %v3319_v57 = vld [vmem:[%s4232_s9 + $0x10] sm:$0xff]  }
 0x291   : > { %2989 = vmatmul.mubr.msk.bf16.vlgmr.msra.gmra.mrb[4].mxu1 %vm942_vm7, %v3312_v59  ;;  %2997 = vmatmul.mubr.msk.bf16.vlgmr.msra.gmra.mrb[8].mxu0 %vm942_vm7, %v3314_v9 }
 0x292   : > { %3012 = vmatprep.mubr.msk.bf16.mxu1 %vm721_vm2, %v3315_v22  ;;  %3028 = vmatprep.mubr.msk.bf16.mxu0 %vm721_vm2, %v3316_v27 }
 0x364   : > { %v2990_v63 = vpop.f32.mrb[4].mxu1 }
 0x365   : > { %v992_v0 = vadd.f32 %v2990_v63, %v925_v62  ;;  %v983_v1 = vpop.f32.mrb[5].mxu1 }
 0x366   : > { %v984_v3 = vadd.f32 %v983_v1, %v915_v60  ;;  %v2991_v4 = vpop.f32.mrb[6].mxu1 }
 0x367   : > { %v1093_v6 = vadd.f32 %v992_v0, %v3678_v23  ;;  %v995_v7 = vadd.f32 %v2991_v4, %v930_v2  ;;  %v986_v8 = vpop.f32.mrb[7].mxu1 }
 0x368   : > { %v1091_v10 = vadd.f32 %v984_v3, %v3684_v25  ;;  %v987_v11 = vadd.f32 %v986_v8, %v920_v61 }
 0x369   : > { %v1094_v12 = vadd.f32 %v995_v7, %v3681_v24  ;;  %v3794_v14 = vmul.f32 %v3675_v16, %v1093_v6 }
 0x36a   : > { %v1092_v13 = vadd.f32 %v987_v11, %v3687_v26  ;;  %v3800_v15 = vmul.f32 %v3675_v16, %v1091_v10  ;;  %v2620_v26 = vld [vmem:[%s4231_s8 + $0x28] sm:$0xff] }
 0x36b   : > { %v3797_v23 = vmul.f32 %v3675_v16, %v1094_v12 }
 0x36c   : > { %v3803_v25 = vmul.f32 %v3675_v16, %v1092_v13 }
 0x36d   : > { %v3250_v17 = vpack.i.bf16 %v3797_v23, %v3794_v14  ;;  %v1122_v48 = vpack.c.bf16 %v3797_v23, %v3794_v14 }
 0x36e   : > { %v3245_v24 = vpack.i.bf16 %v3803_v25, %v3800_v15  ;;  %v1121_v43 = vpack.c.bf16 %v3803_v25, %v3800_v15 }
 0x36f   : > { %3251 = vrot.lane.b32.xlu1 %v3250_v17, %s3501_s23 }
 0x370   : > { %3246 = vrot.lane.b32.xlu0 %v3245_v24, %s3501_s23 }
 0x373   : > { %3261 = vrot.lane.b32.xlu1 %v3250_v17, %s3502_s25 }
 0x374   : > { %3256 = vrot.lane.b32.xlu0 %v3245_v24, %s3502_s25 }
 0x377   : > { %1261 = vperm.xlu1 %3224, %v2620_v26  }
 0x378   : > { %1256 = vperm.xlu0 %3223, %v2619_v18  }
 0x37b   : > { %1271 = vperm.xlu1 %3224, %v2622_v19  }
 0x37c   : > { %1266 = vperm.xlu0 %3223, %v2621_v20  }
 0x37f   : > { %1166 = vperm.xlu1 %3224, %v2608_v21  }
 0x380   : > { %1161 = vperm.xlu0 %3223, %v2607_v28  }
 0x383   : > { %1176 = vperm.xlu1 %3224, %v2610_v29  }
 0x384   : > { %1171 = vperm.xlu0 %3223, %v2609_v30  }
 0x387   : > { %1390 = vperm.xlu1 %3224, %v2636_v31  }
 0x388   : > { %1385 = vperm.xlu0 %3223, %v2635_v32  }
 0x38b   : > { %1400 = vperm.xlu1 %3224, %v2638_v33  }
 0x38c   : > { %1395 = vperm.xlu0 %3223, %v2637_v34  }
 0x3e1   : > { %v3252_v35 = vpop.permute.xlu1 %3251 }
 0x3e2   : > { %v3247_v36 = vpop.permute.xlu0 %3246  ;;  %v3254_v37 = vunpack.i.h.bf16 %v3252_v35  ;;  %v3253_v38 = vunpack.i.l.bf16 %v3252_v35 }
 0x3e3   : > { %v3249_v39 = vunpack.i.h.bf16 %v3247_v36  ;;  %v3248_v40 = vunpack.i.l.bf16 %v3247_v36 }
 0x3e4   : > { %v2780_v42 = vpack.c.bf16 %v3254_v37, %v3253_v38 }
 0x3e5   : > { %v2777_v41 = vpack.c.bf16 %v3249_v39, %v3248_v40  ;;  %v3262_v49 = vpop.permute.xlu1 %3261 }
 0x3e6   : > { %v3257_v45 = vpop.permute.xlu0 %3256  ;;  %v3264_v51 = vunpack.i.h.bf16 %v3262_v49  ;;  %v3263_v52 = vunpack.i.l.bf16 %v3262_v49 }
 0x3e7   : > { %3000 = vmatprep.subr.msk.bf16.mxu1 %vm2776_vm9, %v2777_v41  ;;  %3016 = vmatprep.subr.msk.bf16.mxu0 %vm2776_vm9, %v2777_v41  ;;  %v3259_v46 = vunpack.i.h.bf16 %v3257_v45  ;;  %v3258_v47 = vunpack.i.l.bf16 %v3257_v45 }
 0x3e8   : > { %3001 = vmatpush3.bf16.msk.msra.mxu1 %vm2776_vm9, %v2777_v41  ;;  %3017 = vmatpush3.bf16.msk.msra.mxu0 %vm2776_vm9, %v2777_v41  ;;  %v2786_v54 = vpack.c.bf16 %v3264_v51, %v3263_v52 }
 0x3e9   : > { %3002 = vmatprep.subr.msk.bf16.mxu1 %vm2776_vm9, %v2780_v42  ;;  %3018 = vmatprep.subr.msk.bf16.mxu0 %vm2776_vm9, %v2780_v42  ;;  %v2783_v53 = vpack.c.bf16 %v3259_v46, %v3258_v47 }
 0x3ec   : > { %3003 = vmatpush3.bf16.msk.msra.mxu1 %vm2776_vm9, %v2780_v42  ;;  %3019 = vmatpush3.bf16.msk.msra.mxu0 %vm2776_vm9, %v2780_v42 }
 0x3ed   : > { %3004 = vmatprep.subr.bf16.mxu1 %v1121_v43  ;;  %3020 = vmatprep.subr.bf16.mxu0 %v1121_v43 }
 0x3f0   : > { %3005 = vmatpush3.bf16.msra.mxu1 %v1121_v43  ;;  %3021 = vmatpush3.bf16.msra.mxu0 %v1121_v43 }
 0x3f1   : > { %3006 = vmatprep.subr.bf16.mxu1 %v1122_v48  ;;  %3022 = vmatprep.subr.bf16.mxu0 %v1122_v48 }
 0x3f4   : > { %3007 = vmatpush3.bf16.msra.mxu1 %v1122_v48  ;;  %3023 = vmatpush3.bf16.msra.mxu0 %v1122_v48 }
 0x3f5   : > { %3008 = vmatprep.subr.msk.bf16.mxu1 %vm3859_vm11, %v2783_v53  ;;  %3024 = vmatprep.subr.msk.bf16.mxu0 %vm3859_vm11, %v2783_v53 }
 0x3f6   : > { %v1262_v58 = vpop.permute.xlu1 %1261 }
 0x3f7   : > { %v1257_v59 = vpop.permute.xlu0 %1256 }
 0x3f8   : > { %3009 = vmatpush3.bf16.msk.msra.mxu1 %vm3859_vm11, %v2783_v53  ;;  %3025 = vmatpush3.bf16.msk.msra.mxu0 %vm3859_vm11, %v2783_v53 }
 0x3f9   : > { %3010 = vmatprep.subr.msk.bf16.mxu1 %vm3859_vm11, %v2786_v54  ;;  %3026 = vmatprep.subr.msk.bf16.mxu0 %vm3859_vm11, %v2786_v54 }
 0x3fa   : > { %v1272_v60 = vpop.permute.xlu1 %1271 }
 0x3fb   : > { %v1267_v61 = vpop.permute.xlu0 %1266 }
 0x3fc   : > { %3011 = vmatpush3.bf16.msk.msra.mxu1 %vm3859_vm11, %v2786_v54  ;;  %3027 = vmatpush3.bf16.msk.msra.mxu0 %vm3859_vm11, %v2786_v54 }
 0x3fe   : > { %v1167_v24 = vpop.permute.xlu1 %1166 }
 0x3ff   : > { %3013 = vmatmul.mubr.msk.bf16.vlgmr.msra.gmra.mrb[8].mxu1 %vm721_vm2, %v3317_v55  ;;  %3029 = vmatmul.mubr.msk.bf16.vlgmr.msra.gmra.mrb[12].mxu0 %vm721_vm2, %v3318_v56  ;;  %v1162_v12 = vpop.permute.xlu0 %1161 }
 0x400   : > { %3036 = vmatprep.mubr.msk.bf16.mxu1 %vm942_vm7, %v3319_v57 }
 0x402   : > { %v1177_v21 = vpop.permute.xlu1 %1176 }
 0x403   : > { %v1172_v26 = vpop.permute.xlu0 %1171 }
 0x406   : > { %v1391_v52 = vpop.permute.xlu1 %1390 }
 0x407   : > { %v1386_v51 = vpop.permute.xlu0 %1385 }
 0x40a   : > { %v1401_v57 = vpop.permute.xlu1 %1400 }
 0x40b   : > { %v1396_v53 = vpop.permute.xlu0 %1395 }
 0x4d2   : > { %v3014_v62 = vpop.f32.mrb[8].mxu1  ;;  %v3030_v63 = vpop.f32.mrb[12].mxu0 }
 0x4d3   : > { %v1333_v0 = vadd.f32 %v3030_v63, %v1267_v61  ;;  %v1229_v1 = vpop.f32.mrb[9].mxu1  ;;  %v1324_v2 = vpop.f32.mrb[13].mxu0  ;;  %v1238_v18 = vadd.f32 %v3014_v62, %v1172_v26  ;;  %v2688_v26 = vld [vmem:[%s4234_s11 + $0x48] sm:$0xff] }
 0x4d4   : > { %v1325_v3 = vadd.f32 %v1324_v2, %v1257_v59  ;;  %v3015_v4 = vpop.f32.mrb[10].mxu1  ;;  %v3031_v5 = vpop.f32.mrb[14].mxu0  ;;  %v1230_v19 = vadd.f32 %v1229_v1, %v1162_v12  ;;  %v3324_v12 = vld [vmem:[%s4229_s6 + $0x20] sm:$0xff]  }
 0x4d5   : > { %v2629_v6 = vmul.f32 -1.442695, %v1333_v0  ;;  %v1336_v7 = vadd.f32 %v3031_v5, %v1272_v60  ;;  %v1232_v8 = vpop.f32.mrb[11].mxu1  ;;  %v1327_v9 = vpop.f32.mrb[15].mxu0  ;;  %v1241_v28 = vadd.f32 %v3015_v4, %v1177_v21  ;;  %v3321_v60 = vld [vmem:[%s4233_s10 + $0x10] sm:$0xff]   ;;  %v3322_v0 = vld [vmem:[%s4233_s10 + $0x18] sm:$0xff]  }
 0x4d6   : > { %v2627_v10 = vmul.f32 -1.442695, %v1325_v3  ;;  %v1328_v11 = vadd.f32 %v1327_v9, %v1262_v58  ;;  %v1233_v31 = vadd.f32 %v1232_v8, %v1167_v24  ;;  %3044 = vmatprep.mubr.msk.bf16.mxu0 %vm942_vm7, %v3321_v60  ;;  %v2674_v8 = vld [vmem:[%s4231_s8 + $0x58] sm:$0xff]  ;;  %v2673_v9 = vld [vmem:[%s4231_s8 + $0x50] sm:$0xff] }
 0x4d7   : > { %3361 = vpow2.f32 %v2629_v6  ;;  %v2630_v13 = vmul.f32 -1.442695, %v1336_v7  ;;  %v2661_v24 = vld [vmem:[%s4230_s7 + $0x50] sm:$0xff] }
 0x4d8   : > { %3363 = vpow2.f32 %v2627_v10  ;;  %v2628_v17 = vmul.f32 -1.442695, %v1328_v11  ;;  %v2660_v10 = vld [vmem:[%s4230_s7 + $0x48] sm:$0xff]  ;;  %v3323_v11 = vld [vmem:[%s4228_s5 + $0x20] sm:$0xff]  }
 0x4d9   : > { %3365 = vpow2.f32 %v2630_v13  ;;  %v2659_v13 = vld [vmem:[%s4230_s7 + $0x40] sm:$0xff] }
 0x4da   : > { %3367 = vpow2.f32 %v2628_v17  ;;  %v2662_v17 = vld [vmem:[%s4230_s7 + $0x58] sm:$0xff] }
 0x4db   : > { %3369 = vtanh.f32 %v1238_v18  ;;  %v2687_v18 = vld [vmem:[%s4234_s11 + $0x40] sm:$0xff] }
 0x4dc   : > { %3371 = vtanh.f32 %v1230_v19  ;;  %v2690_v19 = vld [vmem:[%s4234_s11 + $0x58] sm:$0xff] }
 0x4e1   : > { %v3362_v20 = vpop.eup %3361 }
 0x4e2   : > { %v3364_v22 = vpop.eup %3363  ;;  %v1357_v27 = vadd.f32 1.0, %v3362_v20  ;;  %v2689_v20 = vld [vmem:[%s4234_s11 + $0x50] sm:$0xff] }
 0x4e3   : > { %v1355_v29 = vadd.f32 1.0, %v3364_v22  ;;  %v3366_v30 = vpop.eup %3365 }
 0x4e4   : > { %3373 = vrcp.f32 %v1357_v27  ;;  %v1358_v32 = vadd.f32 1.0, %v3366_v30  ;;  %v3368_v33 = vpop.eup %3367 }
 0x4e5   : > { %3375 = vrcp.f32 %v1355_v29  ;;  %v1356_v34 = vadd.f32 1.0, %v3368_v33  ;;  %v3370_v35 = vpop.eup %3369 }
 0x4e6   : > { %3377 = vtanh.f32 %v1241_v28  ;;  %v3372_v36 = vpop.eup %3371 }
 0x4e7   : > { %3379 = vrcp.f32 %v1358_v32 }
 0x4e8   : > { %3381 = vtanh.f32 %v1233_v31 }
 0x4e9   : > { %3383 = vrcp.f32 %v1356_v34 }
 0x4ee   : > { %v3374_v37 = vpop.eup %3373 }
 0x4ef   : > { %v3376_v38 = vpop.eup %3375  ;;  %v1369_v39 = vmul.f32 %v3374_v37, %v3370_v35 }
 0x4f0   : > { %v3378_v40 = vpop.eup %3377  ;;  %v1367_v41 = vmul.f32 %v3376_v38, %v3372_v36 }
 0x4f1   : > { %v3380_v42 = vpop.eup %3379 }
 0x4f2   : > { %v3382_v43 = vpop.eup %3381  ;;  %v1370_v45 = vmul.f32 %v3380_v42, %v3378_v40 }
 0x4f3   : > { %v3384_v46 = vpop.eup %3383 }
 0x4f4   : > { %v1368_v47 = vmul.f32 %v3384_v46, %v3382_v43  ;;  %v1372_v48 = vpack.c.bf16 %v1370_v45, %v1369_v39  ;;  %v3325_v45 = vld [vmem:[%s4228_s5 + $0x28] sm:$0xff]  }
 0x4f5   : > { %v3326_v46 = vld [vmem:[%s4229_s6 + $0x28] sm:$0xff]  }
 0x4f6   : > { %v1371_v49 = vpack.c.bf16 %v1368_v47, %v1367_v41  ;;  %v3327_v47 = vld [vmem:[%s4232_s9 + $0x20] sm:$0xff]  }
 0x4f8   : > { %3032 = vmatprep.subr.bf16.mxu1 %v1371_v49  ;;  %3040 = vmatprep.subr.bf16.mxu0 %v1371_v49 }
 0x4f9   : > { %3033 = vmatpush3.bf16.msra.mxu1 %v1371_v49  ;;  %3041 = vmatpush3.bf16.msra.mxu0 %v1371_v49 }
 0x4fa   : > { %3034 = vmatprep.subr.bf16.mxu1 %v1372_v48  ;;  %3042 = vmatprep.subr.bf16.mxu0 %v1372_v48 }
 0x4fd   : > { %3035 = vmatpush3.bf16.msra.mxu1 %v1372_v48  ;;  %3043 = vmatpush3.bf16.msra.mxu0 %v1372_v48 }
 0x500   : > { %3037 = vmatmul.mubr.msk.bf16.vlgmr.msra.gmra.mrb[12].mxu1 %vm942_vm7, %v3320_v50  ;;  %3045 = vmatmul.mubr.msk.bf16.vlgmr.msra.gmra.mrb[8].mxu0 %vm942_vm7, %v3322_v0 }
 0x501   : > { %3060 = vmatprep.mubr.msk.bf16.mxu1 %vm721_vm2, %v3323_v11  ;;  %3076 = vmatprep.mubr.msk.bf16.mxu0 %vm721_vm2, %v3324_v12 }
 0x5d3   : > { %v3038_v54 = vpop.f32.mrb[12].mxu1 }
 0x5d4   : > { %v1462_v55 = vadd.f32 %v3038_v54, %v1396_v53  ;;  %v1453_v56 = vpop.f32.mrb[13].mxu1 }
 0x5d5   : > { %v1454_v58 = vadd.f32 %v1453_v56, %v1386_v51  ;;  %v3039_v59 = vpop.f32.mrb[14].mxu1 }
 0x5d6   : > { %v1565_v61 = vadd.f32 %v1462_v55, %v3794_v14  ;;  %v1465_v62 = vadd.f32 %v3039_v59, %v1401_v57  ;;  %v1456_v63 = vpop.f32.mrb[15].mxu1 }
 0x5d7   : > { %v1563_v1 = vadd.f32 %v1454_v58, %v3800_v15  ;;  %v1457_v2 = vadd.f32 %v1456_v63, %v1391_v52 }
 0x5d8   : > { %v1566_v3 = vadd.f32 %v1465_v62, %v3797_v23  ;;  %v3908_v5 = vmul.f32 %v3675_v16, %v1565_v61 }
 0x5d9   : > { %v1564_v4 = vadd.f32 %v1457_v2, %v3803_v25  ;;  %v3914_v6 = vmul.f32 %v3675_v16, %v1563_v1  ;;  %v2672_v25 = vld [vmem:[%s4231_s8 + $0x48] sm:$0xff] }
 0x5da   : > { %v3911_v14 = vmul.f32 %v3675_v16, %v1566_v3 }
 0x5db   : > { %v3917_v15 = vmul.f32 %v3675_v16, %v1564_v4  ;;  %v2671_v16 = vld [vmem:[%s4231_s8 + $0x40] sm:$0xff] }
 0x5dc   : > { %v3270_v7 = vpack.i.bf16 %v3911_v14, %v3908_v5  ;;  %v1594_v37 = vpack.c.bf16 %v3911_v14, %v3908_v5 }
 0x5dd   : > { %v3265_v23 = vpack.i.bf16 %v3917_v15, %v3914_v6  ;;  %v1593_v33 = vpack.c.bf16 %v3917_v15, %v3914_v6 }
 0x5de   : > { %3271 = vrot.lane.b32.xlu1 %v3270_v7, %s3503_s27 }
 0x5df   : > { %3266 = vrot.lane.b32.xlu0 %v3265_v23, %s3503_s27 }
 0x5e2   : > { %3281 = vrot.lane.b32.xlu1 %v3270_v7, %s3504_s26 }
 0x5e3   : > { %3276 = vrot.lane.b32.xlu0 %v3265_v23, %s3504_s26  ;;  %s4181_s26 = scalar_lea.hbm %s4238_s15, %s2749_s29 }
 0x5e6   : > { %1733 = vperm.xlu1 %3224, %v2672_v25  }
 0x5e7   : > { %1728 = vperm.xlu0 %3223, %v2671_v16  }
 0x5ea   : > { %1743 = vperm.xlu1 %3224, %v2674_v8  }
 0x5eb   : > { %1738 = vperm.xlu0 %3223, %v2673_v9  }
 0x5ee   : > { %1638 = vperm.xlu1 %3224, %v2660_v10  }
 0x5ef   : > { %1633 = vperm.xlu0 %3223, %v2659_v13  }
 0x5f2   : > { %1648 = vperm.xlu1 %3224, %v2662_v17  }
 0x5f3   : > { %1643 = vperm.xlu0 %3223, %v2661_v24  }
 0x5f6   : > { %1862 = vperm.xlu1 %3224, %v2688_v26  }
 0x5f7   : > { %1857 = vperm.xlu0 %3223, %v2687_v18  }
 0x5fa   : > { %1872 = vperm.xlu1 %3224, %v2690_v19  }
 0x5fb   : > { %1867 = vperm.xlu0 %3223, %v2689_v20  }
 0x650   : > { %v3272_v21 = vpop.permute.xlu1 %3271 }
 0x651   : > { %v3267_v22 = vpop.permute.xlu0 %3266  ;;  %v3274_v27 = vunpack.i.h.bf16 %v3272_v21  ;;  %v3273_v28 = vunpack.i.l.bf16 %v3272_v21 }
 0x652   : > { %v3269_v29 = vunpack.i.h.bf16 %v3267_v22  ;;  %v3268_v30 = vunpack.i.l.bf16 %v3267_v22 }
 0x653   : > { %v2804_v32 = vpack.c.bf16 %v3274_v27, %v3273_v28 }
 0x654   : > { %v2801_v31 = vpack.c.bf16 %v3269_v29, %v3268_v30  ;;  %v3282_v38 = vpop.permute.xlu1 %3281 }
 0x655   : > { %v3277_v34 = vpop.permute.xlu0 %3276  ;;  %v3284_v40 = vunpack.i.h.bf16 %v3282_v38  ;;  %v3283_v41 = vunpack.i.l.bf16 %v3282_v38  ;;  %v3328_v38 = vld [vmem:[%s4232_s9 + $0x28] sm:$0xff]  }
 0x656   : > { %3048 = vmatprep.subr.msk.bf16.mxu1 %vm2800_vm13, %v2801_v31  ;;  %3064 = vmatprep.subr.msk.bf16.mxu0 %vm2800_vm13, %v2801_v31  ;;  %v3279_v35 = vunpack.i.h.bf16 %v3277_v34  ;;  %v3278_v36 = vunpack.i.l.bf16 %v3277_v34 }
 0x657   : > { %3049 = vmatpush3.bf16.msk.msra.mxu1 %vm2800_vm13, %v2801_v31  ;;  %3065 = vmatpush3.bf16.msk.msra.mxu0 %vm2800_vm13, %v2801_v31  ;;  %v2810_v43 = vpack.c.bf16 %v3284_v40, %v3283_v41 }
 0x658   : > { %3050 = vmatprep.subr.msk.bf16.mxu1 %vm2800_vm13, %v2804_v32  ;;  %3066 = vmatprep.subr.msk.bf16.mxu0 %vm2800_vm13, %v2804_v32  ;;  %v2807_v42 = vpack.c.bf16 %v3279_v35, %v3278_v36 }
 0x65b   : > { %3051 = vmatpush3.bf16.msk.msra.mxu1 %vm2800_vm13, %v2804_v32  ;;  %3067 = vmatpush3.bf16.msk.msra.mxu0 %vm2800_vm13, %v2804_v32 }
 0x65c   : > { %3052 = vmatprep.subr.bf16.mxu1 %v1593_v33  ;;  %3068 = vmatprep.subr.bf16.mxu0 %v1593_v33 }
 0x65f   : > { %3053 = vmatpush3.bf16.msra.mxu1 %v1593_v33  ;;  %3069 = vmatpush3.bf16.msra.mxu0 %v1593_v33 }
 0x660   : > { %3054 = vmatprep.subr.bf16.mxu1 %v1594_v37  ;;  %3070 = vmatprep.subr.bf16.mxu0 %v1594_v37 }
 0x663   : > { %3055 = vmatpush3.bf16.msra.mxu1 %v1594_v37  ;;  %3071 = vmatpush3.bf16.msra.mxu0 %v1594_v37 }
 0x664   : > { %3056 = vmatprep.subr.msk.bf16.mxu1 %vm3973_vm15, %v2807_v42  ;;  %3072 = vmatprep.subr.msk.bf16.mxu0 %vm3973_vm15, %v2807_v42 }
 0x665   : > { %v1734_v48 = vpop.permute.xlu1 %1733 }
 0x666   : > { %v1729_v49 = vpop.permute.xlu0 %1728 }
 0x667   : > { %3057 = vmatpush3.bf16.msk.msra.mxu1 %vm3973_vm15, %v2807_v42  ;;  %3073 = vmatpush3.bf16.msk.msra.mxu0 %vm3973_vm15, %v2807_v42 }
 0x668   : > { %3058 = vmatprep.subr.msk.bf16.mxu1 %vm3973_vm15, %v2810_v43  ;;  %3074 = vmatprep.subr.msk.bf16.mxu0 %vm3973_vm15, %v2810_v43 }
 0x669   : > { %v1744_v50 = vpop.permute.xlu1 %1743 }
 0x66a   : > { %v1739_v51 = vpop.permute.xlu0 %1738 }
 0x66b   : > { %3059 = vmatpush3.bf16.msk.msra.mxu1 %vm3973_vm15, %v2810_v43  ;;  %3075 = vmatpush3.bf16.msk.msra.mxu0 %vm3973_vm15, %v2810_v43 }
 0x66d   : > { %v1639_v7 = vpop.permute.xlu1 %1638 }
 0x66e   : > { %3061 = vmatmul.mubr.msk.bf16.vlgmr.msra.gmra.mrb[16].mxu1 %vm721_vm2, %v3325_v45  ;;  %3077 = vmatmul.mubr.msk.bf16.vlgmr.msra.gmra.mrb[16].mxu0 %vm721_vm2, %v3326_v46  ;;  %v1634_v2 = vpop.permute.xlu0 %1633 }
 0x66f   : > { %3084 = vmatprep.mubr.msk.bf16.mxu1 %vm942_vm7, %v3327_v47 }
 0x671   : > { %v1649_v9 = vpop.permute.xlu1 %1648 }
 0x672   : > { %v1644_v23 = vpop.permute.xlu0 %1643 }
 0x675   : > { %v1863_v40 = vpop.permute.xlu1 %1862 }
 0x676   : > { %v1858_v39 = vpop.permute.xlu0 %1857 }
 0x679   : > { %v1873_v46 = vpop.permute.xlu1 %1872 }
 0x67a   : > { %v1868_v41 = vpop.permute.xlu0 %1867 }
 0x741   : > { %v3062_v52 = vpop.f32.mrb[16].mxu1  ;;  %v3078_v53 = vpop.f32.mrb[16].mxu0 }
 0x742   : > { %v1805_v54 = vadd.f32 %v3078_v53, %v1739_v51  ;;  %v1701_v55 = vpop.f32.mrb[17].mxu1  ;;  %v1796_v56 = vpop.f32.mrb[17].mxu0  ;;  %v1710_v25 = vadd.f32 %v3062_v52, %v1644_v23  ;;  %v3330_v53 = vld [vmem:[%s4233_s10 + $0x28] sm:$0xff]   ;;  %v2711_v23 = vld [vmem:[%s4230_s7 + $0x60] sm:$0xff] }
 0x743   : > { %v1797_v57 = vadd.f32 %v1796_v56, %v1729_v49  ;;  %v3063_v58 = vpop.f32.mrb[18].mxu1  ;;  %v3079_v59 = vpop.f32.mrb[18].mxu0  ;;  %v1702_v16 = vadd.f32 %v1701_v55, %v1634_v2  ;;  %v3329_v49 = vld [vmem:[%s4233_s10 + $0x20] sm:$0xff]   ;;  %v2725_v2 = vld [vmem:[%s4231_s8 + $0x70] sm:$0xff] }
 0x744   : > { %v2681_v60 = vmul.f32 -1.442695, %v1805_v54  ;;  %v1808_v61 = vadd.f32 %v3079_v59, %v1744_v50  ;;  %v1704_v62 = vpop.f32.mrb[19].mxu1  ;;  %v1799_v63 = vpop.f32.mrb[19].mxu0  ;;  %v1713_v12 = vadd.f32 %v3063_v58, %v1649_v9  ;;  %3092 = vmatprep.mubr.msk.bf16.mxu0 %vm942_vm7, %v3329_v49  ;;  %v4022_v58 = vld [vmem:[%s3672_s16] ss:$0 sm:$0xff] }
 0x745   : > { %v2679_v0 = vmul.f32 -1.442695, %v1797_v57  ;;  %v1800_v1 = vadd.f32 %v1799_v63, %v1734_v48  ;;  %v1705_v24 = vadd.f32 %v1704_v62, %v1639_v7  ;;  %v3332_v7 = vld [vmem:[%s4229_s6 + $0x30] sm:$0xff]   ;;  %v1002_v9 = vld [vmem:[%s4235_s12] sm:$0xff] }
 0x746   : > { %3385 = vpow2.f32 %v2681_v60  ;;  %v2682_v3 = vmul.f32 -1.442695, %v1808_v61  ;;  %v3335_v49 = vld [vmem:[%s4233_s10 + $0x30] sm:$0xff]  }
 0x747   : > { %3387 = vpow2.f32 %v2679_v0  ;;  %v2680_v4 = vmul.f32 -1.442695, %v1800_v1  ;;  %v2726_v1 = vld [vmem:[%s4231_s8 + $0x78] sm:$0xff] }
 0x748   : > { %3389 = vpow2.f32 %v2682_v3  ;;  %v2712_v3 = vld [vmem:[%s4230_s7 + $0x68] sm:$0xff] }
 0x749   : > { %3391 = vpow2.f32 %v2680_v4  ;;  %v3331_v4 = vld [vmem:[%s4228_s5 + $0x30] sm:$0xff]  }
 0x74a   : > { %3393 = vtanh.f32 %v1710_v25  ;;  %v2714_v25 = vld [vmem:[%s4230_s7 + $0x78] sm:$0xff] }
 0x74b   : > { %3395 = vtanh.f32 %v1702_v16  ;;  %v2713_v16 = vld [vmem:[%s4230_s7 + $0x70] sm:$0xff] }
 0x750   : > { %v3386_v8 = vpop.eup %3385 }
 0x751   : > { %v3388_v10 = vpop.eup %3387  ;;  %v1829_v11 = vadd.f32 1.0, %v3386_v8  ;;  %v1003_v8 = vld [vmem:[%s4235_s12 + $0x8] sm:$0xff] }
 0x752   : > { %v1827_v13 = vadd.f32 1.0, %v3388_v10  ;;  %v3390_v17 = vpop.eup %3389  ;;  %v2648_v10 = vld [vmem:[%s4235_s12 + $0x28] sm:$0xff] }
 0x753   : > { %3397 = vrcp.f32 %v1829_v11  ;;  %v1830_v26 = vadd.f32 1.0, %v3390_v17  ;;  %v3392_v18 = vpop.eup %3391  ;;  %v2647_v11 = vld [vmem:[%s4235_s12 + $0x20] sm:$0xff]  ;;  %v1005_v17 = vld [vmem:[%s4235_s12 + $0x18] sm:$0xff] }
 0x754   : > { %3399 = vrcp.f32 %v1827_v13  ;;  %v1828_v19 = vadd.f32 1.0, %v3392_v18  ;;  %v3394_v20 = vpop.eup %3393  ;;  %v2699_v13 = vld [vmem:[%s4235_s12 + $0x40] sm:$0xff]  ;;  %v2649_v18 = vld [vmem:[%s4235_s12 + $0x30] sm:$0xff] }
 0x755   : > { %3401 = vtanh.f32 %v1713_v12  ;;  %v3396_v21 = vpop.eup %3395  ;;  %v2700_v12 = vld [vmem:[%s4235_s12 + $0x48] sm:$0xff] }
 0x756   : > { %3403 = vrcp.f32 %v1830_v26  ;;  %v2650_v26 = vld [vmem:[%s4235_s12 + $0x38] sm:$0xff] }
 0x757   : > { %3405 = vtanh.f32 %v1705_v24  ;;  %v1004_v24 = vld [vmem:[%s4235_s12 + $0x10] sm:$0xff] }
 0x758   : > { %3407 = vrcp.f32 %v1828_v19  ;;  %v2740_v19 = vld [vmem:[%s4235_s12 + $0x68] sm:$0xff] }
 0x75d   : > { %v3398_v22 = vpop.eup %3397 }
 0x75e   : > { %v3400_v27 = vpop.eup %3399  ;;  %v1841_v28 = vmul.f32 %v3398_v22, %v3394_v20  ;;  %v2739_v20 = vld [vmem:[%s4235_s12 + $0x60] sm:$0xff]  ;;  %v2701_v22 = vld [vmem:[%s4235_s12 + $0x50] sm:$0xff] }
 0x75f   : > { %v3402_v29 = vpop.eup %3401  ;;  %v1839_v30 = vmul.f32 %v3400_v27, %v3396_v21  ;;  %v2702_v21 = vld [vmem:[%s4235_s12 + $0x58] sm:$0xff] }
 0x760   : > { %v3404_v31 = vpop.eup %3403  ;;  %v2742_v27 = vld [vmem:[%s4235_s12 + $0x78] sm:$0xff] }
 0x761   : > { %v3406_v32 = vpop.eup %3405  ;;  %v1842_v33 = vmul.f32 %v3404_v31, %v3402_v29  ;;  %v2423_v29 = vld [vmem:[%s4237_s14] sm:$0xff] }
 0x762   : > { %v3408_v34 = vpop.eup %3407 }
 0x763   : > { %v1840_v35 = vmul.f32 %v3408_v34, %v3406_v32  ;;  %v1844_v36 = vpack.c.bf16 %v1842_v33, %v1841_v28  ;;  %v2741_v28 = vld [vmem:[%s4235_s12 + $0x70] sm:$0xff] }
 0x765   : > { %v1843_v37 = vpack.c.bf16 %v1840_v35, %v1839_v30 }
 0x767   : > { %3080 = vmatprep.subr.bf16.mxu1 %v1843_v37  ;;  %3088 = vmatprep.subr.bf16.mxu0 %v1843_v37 }
 0x768   : > { %3081 = vmatpush3.bf16.msra.mxu1 %v1843_v37  ;;  %3089 = vmatpush3.bf16.msra.mxu0 %v1843_v37 }
 0x769   : > { %3082 = vmatprep.subr.bf16.mxu1 %v1844_v36  ;;  %3090 = vmatprep.subr.bf16.mxu0 %v1844_v36 }
 0x76c   : > { %3083 = vmatpush3.bf16.msra.mxu1 %v1844_v36  ;;  %3091 = vmatpush3.bf16.msra.mxu0 %v1844_v36 }
 0x76f   : > { %3085 = vmatmul.mubr.msk.bf16.vlgmr.msra.gmra.mrb[20].mxu1 %vm942_vm7, %v3328_v38  ;;  %3093 = vmatmul.mubr.msk.bf16.vlgmr.msra.gmra.mrb[8].mxu0 %vm942_vm7, %v3330_v53 }
 0x770   : > { %3108 = vmatprep.mubr.msk.bf16.mxu1 %vm721_vm2, %v3331_v4  ;;  %3124 = vmatprep.mubr.msk.bf16.mxu0 %vm721_vm2, %v3332_v7 }
 0x842   : > { %v3086_v42 = vpop.f32.mrb[20].mxu1 }
 0x843   : > { %v1934_v43 = vadd.f32 %v3086_v42, %v1868_v41  ;;  %v1925_v45 = vpop.f32.mrb[21].mxu1 }
 0x844   : > { %v1926_v47 = vadd.f32 %v1925_v45, %v1858_v39  ;;  %v3087_v48 = vpop.f32.mrb[22].mxu1 }
 0x845   : > { %v2037_v50 = vadd.f32 %v1934_v43, %v3908_v5  ;;  %v1937_v51 = vadd.f32 %v3087_v48, %v1873_v46  ;;  %v1928_v52 = vpop.f32.mrb[23].mxu1  ;;  %v3334_v48 = vld [vmem:[%s4229_s6 + $0x38] sm:$0xff]  }
 0x846   : > { %v2035_v54 = vadd.f32 %v1926_v47, %v3914_v6  ;;  %v1929_v55 = vadd.f32 %v1928_v52, %v1863_v40  ;;  %v3333_v47 = vld [vmem:[%s4228_s5 + $0x38] sm:$0xff]  }
 0x847   : > { %v2038_v56 = vadd.f32 %v1937_v51, %v3911_v14  ;;  %v2041_v5 = vmul.f32 %v4022_v58, %v2037_v50  ;;  %v2724_v14 = vld [vmem:[%s4231_s8 + $0x68] sm:$0xff] }
 0x848   : > { %v2036_v57 = vadd.f32 %v1929_v55, %v3917_v15  ;;  %v2039_v60 = vmul.f32 %v4022_v58, %v2035_v54  ;;  %v2723_v15 = vld [vmem:[%s4231_s8 + $0x60] sm:$0xff] }
 0x849   : > { %v2042_v59 = vmul.f32 %v4022_v58, %v2038_v56 }
 0x84a   : > { %v2040_v61 = vmul.f32 %v4022_v58, %v2036_v57 }
 0x84b   : > { %v3290_v6 = vpack.i.bf16 %v2042_v59, %v2041_v5  ;;  %v4028_v62 = vpack.c.bf16 %v2042_v59, %v2041_v5 }
 0x84c   : > { %v3285_v63 = vpack.i.bf16 %v2040_v61, %v2039_v60  ;;  %v4030_v0 = vpack.c.bf16 %v2040_v61, %v2039_v60 }
 0x84d   : > { %3291 = vrot.lane.b32.xlu1 %v3290_v6, %s3505_s24 }
 0x84e   : > { %3286 = vrot.lane.b32.xlu0 %v3285_v63, %s3505_s24  ;;  %s507_s24 = sand.u32 1, %s3488_s19  }
 0x84f   : > { %s2575_s18 = sshll.u32 %s507_s24, 3 }
 0x850   : > { %s509_s23 = scalar_lea.vmem [#allocation3], %s2575_s18 }
 0x851   : > { %3301 = vrot.lane.b32.xlu1 %v3290_v6, %s3506_s30  ;;  %s2491_s25 = sshll.u32 %s509_s23, 4  ;;  %s4183_s25 = int_to_ptr.vmem [resolvable:$true] %s2491_s25 }
 0x852   : > { %3296 = vrot.lane.b32.xlu0 %v3285_v63, %s3506_s30  ;;  %s4262_s30 = sshll.u32 %s3643_s17, 3  ;;  %s3434_s16 = scalar_lea.vmem %s4183_s25, 128 }
 0x853   : > { %s517_s20 = scalar_lea.vmem %s4224_s1, %s4262_s30  ;;  %s2478_s30 = scalar_lea.sflag [#allocation4], %s507_s24 }
 0x854   : > { %p3435_p11 = scmp.ne.s32.totalorder %s4183_s25, %s3434_s16  ;;  %p3441_p0 = scmp.lt.s32.totalorder %s4183_s25, %s3439_s0 }
 0x855   : > { %2205 = vperm.xlu1 %3224, %v2724_v14  }
 0x856   : > { %2200 = vperm.xlu0 %3223, %v2723_v15   ;;  %p3436_p12 = pnand %p3435_p11, %p3628_p5 }
 0x858   : > { %p3437_p13 = pneg %p3436_p12 }
 0x859   : > { %2215 = vperm.xlu1 %3224, %v2726_v1  }
 0x85a   : > { %2210 = vperm.xlu0 %3223, %v2725_v2  }
 0x85d   : > { %2110 = vperm.xlu1 %3224, %v2712_v3  }
 0x85e   : > { %2105 = vperm.xlu0 %3223, %v2711_v23  }
 0x861   : > { %2120 = vperm.xlu1 %3224, %v2714_v25  }
 0x862   : > { %2115 = vperm.xlu0 %3223, %v2713_v16  }
 0x865   : > { %1013 = vperm.xlu1 %3224, %v1003_v8  }
 0x866   : > { %1008 = vperm.xlu0 %3223, %v1002_v9  }
 0x869   : > { %1485 = vperm.xlu1 %3224, %v2648_v10  }
 0x86a   : > { %1480 = vperm.xlu0 %3223, %v2647_v11  }
 0x86d   : > { %1957 = vperm.xlu1 %3224, %v2700_v12  }
 0x86e   : > { %1952 = vperm.xlu0 %3223, %v2699_v13  }
 0x871   : > { %1023 = vperm.xlu1 %3224, %v1005_v17  }
 0x872   : > { %1018 = vperm.xlu0 %3223, %v1004_v24  }
 0x875   : > { %1495 = vperm.xlu1 %3224, %v2650_v26  }
 0x876   : > { %1490 = vperm.xlu0 %3223, %v2649_v18  }
 0x879   : > { %2334 = vperm.xlu1 %3224, %v2740_v19  }
 0x87a   : > { %2329 = vperm.xlu0 %3223, %v2739_v20  }
 0x87d   : > { %1967 = vperm.xlu1 %3224, %v2702_v21  }
 0x87e   : > { %1962 = vperm.xlu0 %3223, %v2701_v22  }
 0x881   : > { %2344 = vperm.xlu1 %3224, %v2742_v27  }
 0x882   : > { %2339 = vperm.xlu0 %3223, %v2741_v28  }
 0x886   : > { %2426 = vperm.xlu0 %3223, %v2423_v29  }
 0x8bf   : > { %v3292_v30 = vpop.permute.xlu1 %3291 }
 0x8c0   : > { %v3287_v31 = vpop.permute.xlu0 %3286  ;;  %v3294_v32 = vunpack.i.h.bf16 %v3292_v30  ;;  %v3293_v33 = vunpack.i.l.bf16 %v3292_v30 }
 0x8c1   : > { %v3289_v34 = vunpack.i.h.bf16 %v3287_v31  ;;  %v3288_v35 = vunpack.i.l.bf16 %v3287_v31 }
 0x8c2   : > { %v2828_v37 = vpack.c.bf16 %v3294_v32, %v3293_v33 }
 0x8c3   : > { %v2825_v36 = vpack.c.bf16 %v3289_v34, %v3288_v35  ;;  %v3302_v41 = vpop.permute.xlu1 %3301 }
 0x8c4   : > { %v3297_v38 = vpop.permute.xlu0 %3296  ;;  %v3304_v43 = vunpack.i.h.bf16 %v3302_v41  ;;  %v3303_v45 = vunpack.i.l.bf16 %v3302_v41 }
 0x8c5   : > { %3096 = vmatprep.subr.msk.bf16.mxu1 %vm2824_vm1, %v2825_v36  ;;  %3112 = vmatprep.subr.msk.bf16.mxu0 %vm2824_vm1, %v2825_v36  ;;  %v3299_v39 = vunpack.i.h.bf16 %v3297_v38  ;;  %v3298_v40 = vunpack.i.l.bf16 %v3297_v38  ;;  %v3507_v38 = vmov 0.0  }
 0x8c6   : > { %3097 = vmatpush3.bf16.msk.msra.mxu1 %vm2824_vm1, %v2825_v36  ;;  %3113 = vmatpush3.bf16.msk.msra.mxu0 %vm2824_vm1, %v2825_v36  ;;  %v2834_v44 = vpack.c.bf16 %v3304_v43, %v3303_v45 }
 0x8c7   : > { %3098 = vmatprep.subr.msk.bf16.mxu1 %vm2824_vm1, %v2828_v37  ;;  %3114 = vmatprep.subr.msk.bf16.mxu0 %vm2824_vm1, %v2828_v37  ;;  %v2831_v46 = vpack.c.bf16 %v3299_v39, %v3298_v40 }
 0x8ca   : > { %3099 = vmatpush3.bf16.msk.msra.mxu1 %vm2824_vm1, %v2828_v37  ;;  %3115 = vmatpush3.bf16.msk.msra.mxu0 %vm2824_vm1, %v2828_v37  ;;  %v3336_v37 = vld [vmem:[%s4233_s10 + $0x38] sm:$0xff]  }
 0x8cb   : > { %3100 = vmatprep.subr.bf16.mxu1 %v4030_v0  ;;  %3116 = vmatprep.subr.bf16.mxu0 %v4030_v0 }
 0x8ce   : > { %3101 = vmatpush3.bf16.msra.mxu1 %v4030_v0  ;;  %3117 = vmatpush3.bf16.msra.mxu0 %v4030_v0 }
 0x8cf   : > { %3102 = vmatprep.subr.bf16.mxu1 %v4028_v62  ;;  %3118 = vmatprep.subr.bf16.mxu0 %v4028_v62 }
 0x8d2   : > { %3103 = vmatpush3.bf16.msra.mxu1 %v4028_v62  ;;  %3119 = vmatpush3.bf16.msra.mxu0 %v4028_v62 }
 0x8d3   : > { %3104 = vmatprep.subr.msk.bf16.mxu1 %vm4123_vm4, %v2831_v46  ;;  %3120 = vmatprep.subr.msk.bf16.mxu0 %vm4123_vm4, %v2831_v46 }
 0x8d4   : > { %v2206_v50 = vpop.permute.xlu1 %2205 }
 0x8d5   : > { %v2201_v51 = vpop.permute.xlu0 %2200 }
 0x8d6   : > { %3105 = vmatpush3.bf16.msk.msra.mxu1 %vm4123_vm4, %v2831_v46  ;;  %3121 = vmatpush3.bf16.msk.msra.mxu0 %vm4123_vm4, %v2831_v46 }
 0x8d7   : > { %3106 = vmatprep.subr.msk.bf16.mxu1 %vm4123_vm4, %v2834_v44  ;;  %3122 = vmatprep.subr.msk.bf16.mxu0 %vm4123_vm4, %v2834_v44 }
 0x8d8   : > { %v2216_v52 = vpop.permute.xlu1 %2215 }
 0x8d9   : > { %v2211_v53 = vpop.permute.xlu0 %2210 }
 0x8da   : > { %3107 = vmatpush3.bf16.msk.msra.mxu1 %vm4123_vm4, %v2834_v44  ;;  %3123 = vmatpush3.bf16.msk.msra.mxu0 %vm4123_vm4, %v2834_v44 }
 0x8db   : > { %3136 = vmatprep.subr.bf16.mxu1 %v3507_v38 }
 0x8dc   : > { %v2111_v4 = vpop.permute.xlu1 %2110 }
 0x8dd   : > { %3109 = vmatmul.mubr.msk.bf16.vlgmr.msra.gmra.mrb[24].mxu1 %vm721_vm2, %v3333_v47  ;;  %3125 = vmatmul.mubr.msk.bf16.vlgmr.msra.gmra.mrb[20].mxu0 %vm721_vm2, %v3334_v48  ;;  %v2106_v1 = vpop.permute.xlu0 %2105  ;;  %vm3508_vm2 = vmmov 0  }
 0x8de   : > { %3132 = vmatprep.mubr.msk.bf16.mxu0 %vm942_vm7, %v3335_v49  ;;  %3140 = vmatprep.mubr.msk.bf16.mxu1 %vm3508_vm2, %v3507_v38 }
 0x8e0   : > { %v2121_v8 = vpop.permute.xlu1 %2120 }
 0x8e1   : > { %v2116_v7 = vpop.permute.xlu0 %2115 }
 0x8e4   : > { %v1014_v40 = vpop.permute.xlu1 %1013 }
 0x8e5   : > { %v1009_v39 = vpop.permute.xlu0 %1008 }
 0x8e8   : > { %v1486_v42 = vpop.permute.xlu1 %1485 }
 0x8e9   : > { %v1481_v41 = vpop.permute.xlu0 %1480 }
 0x8ec   : > { %v1958_v45 = vpop.permute.xlu1 %1957 }
 0x8ed   : > { %v1953_v43 = vpop.permute.xlu0 %1952 }
 0x8f0   : > { %v1024_v44 = vpop.permute.xlu1 %1023 }
 0x8f1   : > { %v1019_v46 = vpop.permute.xlu0 %1018 }
 0x8f4   : > { %v1496_v48 = vpop.permute.xlu1 %1495 }
 0x8f5   : > { %v1491_v47 = vpop.permute.xlu0 %1490 }
 0x8f9   : > { %v2330_v49 = vpop.permute.xlu0 %2329 }
 0x9b0   : > { %v3110_v54 = vpop.f32.mrb[24].mxu1  ;;  %v3126_v55 = vpop.f32.mrb[20].mxu0 }
 0x9b1   : > { %v2277_v56 = vadd.f32 %v3126_v55, %v2211_v53  ;;  %v2173_v57 = vpop.f32.mrb[25].mxu1  ;;  %v2268_v5 = vpop.f32.mrb[21].mxu0  ;;  %v2182_v23 = vadd.f32 %v3110_v54, %v2116_v7  ;;  %v3144_v53 = vadd.f32 %v1491_v47, %v1019_v46  ;;  %v3148_v54 = vadd.f32 %v1481_v41, %v1009_v39 }
 0x9b2   : > { %v2269_v59 = vadd.f32 %v2268_v5, %v2201_v51  ;;  %v3111_v60 = vpop.f32.mrb[26].mxu1  ;;  %v3127_v61 = vpop.f32.mrb[22].mxu0  ;;  %v2174_v25 = vadd.f32 %v2173_v57, %v2106_v1  ;;  %v3156_v5 = vadd.f32 %v1486_v42, %v1014_v40 }
 0x9b3   : > { %v2733_v6 = vmul.f32 -1.442695, %v2277_v56  ;;  %v2280_v62 = vadd.f32 %v3127_v61, %v2216_v52  ;;  %v2176_v63 = vpop.f32.mrb[27].mxu1  ;;  %v2271_v0 = vpop.f32.mrb[23].mxu0  ;;  %v2185_v11 = vadd.f32 %v3111_v60, %v2121_v8  ;;  %v3152_v56 = vadd.f32 %v1496_v48, %v1024_v44 }
 0x9b4   : > { %v2731_v14 = vmul.f32 -1.442695, %v2269_v59  ;;  %v2272_v15 = vadd.f32 %v2271_v0, %v2206_v50  ;;  %v2177_v17 = vadd.f32 %v2176_v63, %v2111_v4  ;;  %v2335_v50 = vpop.permute.xlu1 %2334  ;;  %v1963_v51 = vpop.permute.xlu0 %1962  ;;  %v3149_v59 = vadd.f32 %v3148_v54, %v1953_v43 }
 0x9b5   : > { %3409 = vpow2.f32 %v2733_v6  ;;  %v2734_v2 = vmul.f32 -1.442695, %v2280_v62  ;;  %v3145_v57 = vadd.f32 %v3144_v53, %v1963_v51  ;;  %v3157_v62 = vadd.f32 %v3156_v5, %v1958_v45 }
 0x9b6   : > { %3411 = vpow2.f32 %v2731_v14  ;;  %v2732_v3 = vmul.f32 -1.442695, %v2272_v15  ;;  %v3150_v63 = vadd.f32 %v3149_v59, %v2330_v49 }
 0x9b7   : > { %3413 = vpow2.f32 %v2734_v2  ;;  %v3158_v2 = vadd.f32 %v3157_v62, %v2335_v50 }
 0x9b8   : > { %3415 = vpow2.f32 %v2732_v3  ;;  %v1968_v52 = vpop.permute.xlu1 %1967  ;;  %v2340_v55 = vpop.permute.xlu0 %2339 }
 0x9b9   : > { %3417 = vtanh.f32 %v2182_v23  ;;  %v3153_v61 = vadd.f32 %v3152_v56, %v1968_v52  ;;  %v3146_v6 = vadd.f32 %v3145_v57, %v2340_v55 }
 0x9ba   : > { %3419 = vtanh.f32 %v2174_v25 }
 0x9bc   : > { %v2345_v60 = vpop.permute.xlu1 %2344 }
 0x9bd   : > { %v3154_v14 = vadd.f32 %v3153_v61, %v2345_v60 }
 0x9bf   : > { %v3410_v16 = vpop.eup %3409 }
 0x9c0   : > { %v3412_v9 = vpop.eup %3411  ;;  %v2301_v10 = vadd.f32 1.0, %v3410_v16 }
 0x9c1   : > { %v2299_v12 = vadd.f32 1.0, %v3412_v9  ;;  %v3414_v13 = vpop.eup %3413 }
 0x9c2   : > { %3421 = vrcp.f32 %v2301_v10  ;;  %v2302_v24 = vadd.f32 1.0, %v3414_v13  ;;  %v3416_v26 = vpop.eup %3415  ;;  %v2420_v13 = vld [vmem:[%s4236_s13] sm:$0xf] }
 0x9c3   : > { %3423 = vrcp.f32 %v2299_v12  ;;  %v2300_v18 = vadd.f32 1.0, %v3416_v26  ;;  %v3418_v19 = vpop.eup %3417 }
 0x9c4   : > { %3425 = vtanh.f32 %v2185_v11  ;;  %v3420_v20 = vpop.eup %3419 }
 0x9c5   : > { %3427 = vrcp.f32 %v2302_v24  ;;  %v2427_v24 = vpop.permute.xlu0 %2426 }
 0x9c6   : > { %3429 = vtanh.f32 %v2177_v17  ;;  %v2473_v17 = vld [vmem:[%s517_s20] sm:$0xff]  ;;  %s3440_s20 = scalar_lea.vmem %s3439_s0, 256 }
 0x9c7   : > { %3431 = vrcp.f32 %v2300_v18  ;;  %v2474_v18 = vmul.f32 %v4022_v58, %v2473_v17  ;;  %p3442_p1 = scmp.lt.s32.totalorder %s3440_s20, %s3434_s16 }
 0x9c9   : > { %p3443_p2 = por %p3442_p1, %p3441_p0 }
 0x9cb   : > { %p3444_p3 = pnand %p3443_p2, %p3437_p13 }
 0x9cc   : > { %v3422_v21 = vpop.eup %3421 }
 0x9cd   : > { %v3424_v22 = vpop.eup %3423  ;;  %v2313_v27 = vmul.f32 %v3422_v21, %v3418_v19 }
 0x9ce   : > { %v3426_v28 = vpop.eup %3425  ;;  %v2311_v29 = vmul.f32 %v3424_v22, %v3420_v20 }
 0x9cf   : > { %v3428_v30 = vpop.eup %3427 }
 0x9d0   : > { %v3430_v31 = vpop.eup %3429  ;;  %v2314_v32 = vmul.f32 %v3428_v30, %v3426_v28 }
 0x9d1   : > { %v3432_v33 = vpop.eup %3431 }
 0x9d2   : > { %v2312_v34 = vmul.f32 %v3432_v33, %v3430_v31  ;;  %v2316_v35 = vpack.c.bf16 %v2314_v32, %v2313_v27 }
 0x9d4   : > { %v2315_v36 = vpack.c.bf16 %v2312_v34, %v2311_v29 }
 0x9d6   : > { %3128 = vmatprep.subr.bf16.mxu0 %v2315_v36 }
 0x9d7   : > { %3129 = vmatpush3.bf16.msra.mxu0 %v2315_v36 }
 0x9d8   : > { %3130 = vmatprep.subr.bf16.mxu0 %v2316_v35 }
 0x9db   : > { %3131 = vmatpush3.bf16.msra.mxu0 %v2316_v35 }
 0x9de   : > { %3133 = vmatmul.mubr.msk.bf16.vlgmr.msra.gmra.mrb[8].mxu0 %vm942_vm7, %v3336_v37 }
 0xab1   : > { %v3134_v0 = vpop.f32.mrb[8].mxu0 }
 0xab2   : > { %v3147_v15 = vadd.f32 %v3146_v6, %v3134_v0  ;;  %v2397_v1 = vpop.f32.mrb[9].mxu0 }
 0xab3   : > { %v3151_v3 = vadd.f32 %v3150_v63, %v2397_v1  ;;  %v3135_v4 = vpop.f32.mrb[10].mxu0 }
 0xab4   : > { %v3155_v7 = vadd.f32 %v3154_v14, %v3135_v4  ;;  %v2400_v23 = vpop.f32.mrb[11].mxu0  ;;  %v2418_v16 = vmul.f32 %v4022_v58, %v3147_v15 }
 0xab5   : > { %v3159_v25 = vadd.f32 %v3158_v2, %v2400_v23  ;;  %v2416_v9 = vmul.f32 %v4022_v58, %v3151_v3 }
 0xab6   : > { %v2419_v8 = vmul.f32 %v4022_v58, %v3155_v7 }
 0xab7   : > { %v2417_v10 = vmul.f32 %v4022_v58, %v3159_v25 }
 0xab8   : > { %v2422_v11 = vpack.c.bf16 %v2419_v8, %v2418_v16 }
 0xab9   : > { %v2421_v12 = vpack.c.bf16 %v2417_v10, %v2416_v9 }
 0xabb   : > { %3137 = vmatpush3.bf16.msra.mxu1 %v2421_v12 }
 0xabc   : > { %3138 = vmatprep.subr.bf16.mxu1 %v3507_v38 }
 0xabf   : > { %3139 = vmatpush3.bf16.msra.mxu1 %v2422_v11 }
 0xac2   : > { %3141 = vmatmul.mubr.msk.bf16.vlgmr.msra.gmra.mrb[28].mxu1 %vm942_vm7, %v2420_v13 }
 0xb95   : > { %v2466_v26 = vpop.f32.mrb[28].mxu1 }
 0xb96   : > { %v2467_v19 = vadd.f32 %v2466_v26, %v2427_v24  ;;  %v3142_v20 = vpop.f32.mrb[29].mxu1 }
 0xb97   : > { %v2469_v21 = vpop.f32.mrb[30].mxu1 }
 0xb98   : > { %v2472_v22 = vmul.f32 %v4022_v58, %v2467_v19  ;;  %v3143_v27 = vpop.f32.mrb[31].mxu1 }
 0xb9a   : > { %v2475_v28 = vadd.f32 %v2474_v18, %v2472_v22 }
 0xb9c   : > { %2476 = vst [vmem:[%s509_s23] sm:$0xff] %v2475_v28 }
 0xb9d   : > { %3447 = shalt.err (!%p3444_p3)
}
 0xb9e   : > { %s3448_s24 = scalar_lea.hbm %s4181_s26, 128  ;;  %s3452_s23 = scalar_lea.hbm %s4238_s15, 512 }
 0xb9f   : > { %p3449_p4 = scmp.ne.s32.totalorder %s4181_s26, %s3448_s24  ;;  %p3453_p9 = scmp.lt.u32.totalorder %s4181_s26, %s4238_s15 }
 0xba0   : > { %p3454_p10 = scmp.lt.u32.totalorder %s3452_s23, %s3448_s24  ;;  %p3456_p12 = scmp.lt.u32.totalorder %s3448_s24, %s4181_s26 }
 0xba1   : > { %p3450_p7 = pnand %p3449_p4, %p3628_p5 }
 0xba2   : > { %p3455_p11 = por %p3454_p10, %p3453_p9 }
 0xba3   : > { %p3451_p8 = pneg %p3450_p7 }
 0xba4   : > { %p3457_p13 = por %p3456_p12, %p3455_p11 }
 0xba6   : > { %p3458_p0 = pnand %p3457_p13, %p3451_p8 }
 0xba8   : > { %3461 = shalt.err (!%p3458_p0)
}
 0xba9   : > { %3173 = dma.vmem_to_hbm [thread:$0]  (%p3628_p5), %s4183_s25, 128, %s4181_s26, %s2478_s30  }
 0xbaa PF: > { %s4263_s16 = sld [smem:[#allocation6_spill]]  ;;  %p3179_p1 = scmp.ge.s32.totalorder %s3496_s21, 2 }
 0xbac   : > { %p3176_p2 = pnand %p3179_p1, %p3632_p6 }
 0xbb0   : > { %s2503_s0 = sand.u32 1, %s4263_s16  }
 0xbb1   : > { %s2504_s20 = scalar_lea.sflag [#allocation4], %s2503_s0 }
 0xbb2   : > { %3479 = dma.done.wait (!%p3176_p2), %s2504_s20, 128  }
 0xbb3   : > { %3481 = vsyncadd (!%p3176_p2), %s2504_s20, 4294967168  ;;  %s4265_s21 = sld [smem:[#allocation8_spill]]  ;;  %s4266_s24 = sld [smem:[#allocation7_spill]] }
 0xbb4   : > { %s4267_s20 = sld [smem:[#allocation9_spill]]  ;;  %s4268_s18 = smov %s3488_s19 }
 0xbb9   : > { %p25_p3 = scmp.ge.s32.totalorder %s4265_s21, 6   ;;  %s4269_s19 = smov %s4266_s24 }
 0xbbb   :  { %27 = sbr.rel (!%p25_p3) target bundleno = 5 (0x5), region = 143 }
 0xbc2   :  { %2509 = vsyncpa [#allocation4], 1 }
 0xbc3   :  { %2511 = vsyncpa [#allocation4 + $0x1], 1 }

</bundles_post_ra>
